<compile_context>
chip_gen: v7x
topology: tpu7x:2x2x1
jax: 0.10.0
libtpu: 0.0.40
codegen_flags: <defaults>
</compile_context>

<pallas_src>
import functools

import numpy as np
import jax
import jax.numpy as jnp
from jax.experimental import pallas as pl
from jax.experimental.pallas import tpu as pltpu

BN_EPS = 1e-5
_SQRT_2_OVER_PI = 0.7978845608028654
_GELU_C = 0.044715


# ----------------------------------------------------------------------------
# In-kernel math helpers
# ----------------------------------------------------------------------------
def _dot(a, b):
    return jnp.dot(a, b, preferred_element_type=jnp.float32)


def _gelu(x):
    # tanh-approx GELU (EUP tanh + a few VALU ops).
    # TODO(synk): torch.nn.GELU() default is the exact erf form; the tanh
    # approximation deviates by <~1e-3 absolute.
    return 0.5 * x * (1.0 + jnp.tanh(_SQRT_2_OVER_PI * (x + _GELU_C * x * x * x)))


def _bn_gelu(y, gamma, beta, m_rows):
    # Training-mode BatchNorm1d over the flattened (B*L) axis, single pass
    # (sum and sum-of-squares), biased variance -- matches PyTorch train().
    # TODO(synk): running-mean/var buffer updates (module state) not emulated.
    inv_m = 1.0 / float(m_rows)
    mean = jnp.sum(y, axis=0, keepdims=True) * inv_m
    var = jnp.sum(y * y, axis=0, keepdims=True) * inv_m - mean * mean
    var = jnp.maximum(var, 0.0)
    scale = gamma * jax.lax.rsqrt(var + BN_EPS)
    shift = beta - mean * scale
    return _gelu(y * scale + shift)


def _k3_bn_gelu(h, mask_prev, mask_next, w_m1, w_0, w_p1, g, t, m_rows):
    # Conv1d(kernel=3, padding=1) as three matmuls over shifted activations.
    # pltpu.roll follows jnp.roll semantics: shift=+1 moves rows to higher
    # indices, i.e. rolled[r] = h[r-1].  The (M, 1) masks zero the rows at
    # per-batch boundaries (and the circular wraparound rows), giving the same
    # zero padding as PyTorch's padding=1.
    # Conv bias is omitted on purpose: BatchNorm (train mode) follows, and the
    # bias cancels exactly in (y - mean(y)).
    h_prev = pltpu.roll(h, 1, 0) * mask_prev
    h_next = pltpu.roll(h, m_rows - 1, 0) * mask_next
    y = _dot(h_prev, w_m1) + _dot(h, w_0) + _dot(h_next, w_p1)
    return _bn_gelu(y, g, t, m_rows)


# ----------------------------------------------------------------------------
# The fused decoder-block kernel
# ----------------------------------------------------------------------------
def _decoder_block_kernel(*refs, use_x, decoder_residual, dec_dim, z_dim,
                          m_rows, out_lanes):
    x_ref, cond_ref, src_ref, eps_ref, mp_ref, mn_ref = refs[:6]
    prm = refs[6:-1]
    o_ref = refs[-1]

    mask_prev = mp_ref[...]   # (M, 1): 0.0 where l == 0 within a batch
    mask_next = mn_ref[...]   # (M, 1): 0.0 where l == L-1 within a batch
    cond = cond_ref[...]
    src = src_ref[...]
    if use_x:
        x = x_ref[...]
        y = x + cond
    else:
        x = cond                      # forward(): `y = x = cond`
        y = cond

    (qw1y, qw1s, qg1, qt1,
     qw2a, qw2b, qw2c, qg2, qt2,
     qw3a, qw3b, qw3c, qg3, qt3,
     qw4m, qb4m, qw4s, qb4s) = [r[...] for r in prm[0:18]]
    zw, zb = [r[...] for r in prm[18:20]]
    (ow1, og1, ot1,
     ow2a, ow2b, ow2c, og2, ot2,
     ow3a, ow3b, ow3c, og3, ot3,
     ow4, ob4) = [r[...] for r in prm[20:35]]

    # ---- q ConvBlock (type 0) over channel-concat([y, src]) -----------------
    # 1x1 conv over the concat == split matmul (no in-kernel lane concat).
    # Biases of BN-followed convs are dropped (they cancel in train-mode BN).
    h = _bn_gelu(_dot(y, qw1y) + _dot(src, qw1s), qg1, qt1, m_rows)
    h = _k3_bn_gelu(h, mask_prev, mask_next, qw2a, qw2b, qw2c, qg2, qt2, m_rows)
    h = _k3_bn_gelu(h, mask_prev, mask_next, qw3a, qw3b, qw3c, qg3, qt3, m_rows)
    q_mean = _dot(h, qw4m) + qb4m            # (M, z_dim)
    q_logstd = _dot(h, qw4s) + qb4s          # (M, z_dim)

    # ---- KL(q || N(0,1)), reparameterized sample, z_proj (fused epilogue) ---
    std = jnp.exp(q_logstd)
    kl = -q_logstd + 0.5 * (std * std + q_mean * q_mean) - 0.5
    z = q_mean + eps_ref[...] * std
    # z_proj=True: learned 1x1 conv.  z_proj=False: the wrapper passes a fixed
    # (z_dim, dec_dim) selector so the same matmul implements y[:, :z_dim]+=z.
    y = y + _dot(z, zw) + zb

    # ---- out ConvBlock (type 0) ----------------------------------------------
    h = _bn_gelu(_dot(y, ow1), og1, ot1, m_rows)
    h = _k3_bn_gelu(h, mask_prev, mask_next, ow2a, ow2b, ow2c, og2, ot2, m_rows)
    h = _k3_bn_gelu(h, mask_prev, mask_next, ow3a, ow3b, ow3c, og3, ot3, m_rows)
    out = _dot(h, ow4) + ob4

    if decoder_residual:
        out = x + out

    # ---- lane-dense (M, 128) output slab: [ y | kl | zero pad ] --------------
    o_ref[...] = jnp.zeros((m_rows, out_lanes), jnp.float32)
    o_ref[:, 0:dec_dim] = out
    o_ref[:, dec_dim:dec_dim + z_dim] = kl


# ----------------------------------------------------------------------------
# Host-side helpers
# ----------------------------------------------------------------------------
def _boundary_masks(b, l):
    # mask_prev is 0 on rows where l == 0 (per batch), mask_next where l == L-1.
    # Built once at trace time from static shapes; also covers the circular
    # wraparound rows of pltpu.roll.
    m = b * l
    mp = np.ones((m, 1), np.float32)
    mn = np.ones((m, 1), np.float32)
    mp[0::l, 0] = 0.0
    mn[l - 1::l, 0] = 0.0
    return jnp.asarray(mp), jnp.asarray(mn)


def _row(v):
    return v.reshape(1, -1)


def _flatten_params(params, hp, dec_dim):
    z_dim = hp.z_dim

    def k3_taps(w):  # (3*C, H) stored as [tap l-1 ; tap l ; tap l+1]
        c = w.shape[0] // 3
        return [w[0:c], w[c:2 * c], w[2 * c:3 * c]]

    q = params['q']
    flat = ([q['w1'][:dec_dim], q['w1'][dec_dim:], _row(q['g1']), _row(q['t1'])]
            + k3_taps(q['w2']) + [_row(q['g2']), _row(q['t2'])]
            + k3_taps(q['w3']) + [_row(q['g3']), _row(q['t3'])]
            + [q['w4'][:, :z_dim], _row(q['b4'][:z_dim]),      # q_mean head
               q['w4'][:, z_dim:], _row(q['b4'][z_dim:])])     # q_logstd head
    if hp.z_proj:
        flat += [params['z_proj_w'], _row(params['z_proj_b'])]
    else:
        # Emulate `y[:, :z_dim] += z` through the same matmul path.
        flat += [jnp.eye(z_dim, dec_dim, dtype=jnp.float32),
                 jnp.zeros((1, dec_dim), jnp.float32)]
    o = params['out']
    flat += ([o['w1'], _row(o['g1']), _row(o['t1'])]
             + k3_taps(o['w2']) + [_row(o['g2']), _row(o['t2'])]
             + k3_taps(o['w3']) + [_row(o['g3']), _row(o['t3'])]
             + [o['w4'], _row(o['b4'])])
    return flat


def make_forward(hp):
    dec_dim = hp.dec_dim
    enc_dim = hp.enc_dim
    z_dim = hp.z_dim

    @jax.jit
    def forward(params, x_ncl, src_ncl, cond_ncl, eps_blz):
        to_blc = lambda a: jnp.transpose(a, (0, 2, 1))
        cond = to_blc(cond_ncl)
        src = to_blc(src_ncl)
        b, l, _ = cond.shape
        m = b * l
        use_x = x_ncl is not None

        cond2d = cond.reshape(m, dec_dim)
        src2d = src.reshape(m, enc_dim)
        eps2d = eps_blz.reshape(m, z_dim)
        x2d = to_blc(x_ncl).reshape(m, dec_dim) if use_x else cond2d

        mask_prev, mask_next = _boundary_masks(b, l)
        flat = _flatten_params(params, hp, dec_dim)

        out_lanes = max(128, ((dec_dim + z_dim + 127) // 128) * 128)
        kernel = functools.partial(
            _decoder_block_kernel,
            use_x=use_x, decoder_residual=hp.decoder_residual,
            dec_dim=dec_dim, z_dim=z_dim, m_rows=m, out_lanes=out_lanes)

        vmem = pl.BlockSpec(memory_space=pltpu.MemorySpace.VMEM)
        n_in = 6 + len(flat)
        # TODO(synk): gridless on purpose -- train-mode BatchNorm needs the full
        # (B*L, C) slab in one block; adding an M grid (e.g. v7x 2-TC split)
        # requires a two-pass BN (accumulate sum/sumsq, then normalize).
        slab = pl.pallas_call(
            kernel,
            out_shape=jax.ShapeDtypeStruct((m, out_lanes), jnp.float32),
            in_specs=[vmem] * n_in,
            out_specs=vmem,
        )(x2d, cond2d, src2d, eps2d, mask_prev, mask_next, *flat)

        y = slab[:, :dec_dim].reshape(b, l, dec_dim)
        kl = slab[:, dec_dim:dec_dim + z_dim].reshape(b, l, z_dim)
        return jnp.transpose(y, (0, 2, 1)), jnp.transpose(kl, (0, 2, 1))

    return forward


# ----------------------------------------------------------------------------
# Deterministic parameter init (synthetic; matches module __init__ shapes)
# ----------------------------------------------------------------------------
def _init_conv_block(key, cin, ch, cout):
    ks = jax.random.split(key, 8)
    w = lambda k, shape: 0.02 * jax.random.normal(k, shape, jnp.float32)

    def bias(k, n, fan_in):
        bound = 1.0 / (fan_in ** 0.5)
        return jax.random.uniform(k, (n,), jnp.float32, -bound, bound)

    ones = lambda n: jnp.ones((n,), jnp.float32)
    zeros = lambda n: jnp.zeros((n,), jnp.float32)
    # k=3 conv weights are stored as (3*cin_rows, cout) with row blocks ordered
    # [tap l-1 ; tap l ; tap l+1].  b1/b2/b3 exist for module-shape fidelity but
    # are not passed to the kernel (they cancel under train-mode BatchNorm).
    return dict(
        w1=w(ks[0], (cin, ch)), b1=bias(ks[1], ch, cin), g1=ones(ch), t1=zeros(ch),
        w2=w(ks[2], (3 * ch, ch)), b2=bias(ks[3], ch, 3 * ch), g2=ones(ch), t2=zeros(ch),
        w3=w(ks[4], (3 * ch, ch)), b3=bias(ks[5], ch, 3 * ch), g3=ones(ch), t3=zeros(ch),
        w4=w(ks[6], (ch, cout)), b4=bias(ks[7], cout, ch),
    )


def init_params(key, hp):
    kq, ko, kz = jax.random.split(key, 3)
    params = {
        'q': _init_conv_block(kq, hp.dec_dim + hp.enc_dim, hp.dec_hidden_dim,
                              hp.z_dim * 2),
        'out': _init_conv_block(ko, hp.dec_dim, hp.dec_hidden_dim, hp.dec_dim),
    }
    if hp.z_proj:
        kz1, kz2 = jax.random.split(kz)
        params['z_proj_w'] = 0.02 * jax.random.normal(kz1, (hp.z_dim, hp.dec_dim),
                                                      jnp.float32)
        bound = 1.0 / (hp.z_dim ** 0.5)
        params['z_proj_b'] = jax.random.uniform(kz2, (hp.dec_dim,), jnp.float32,
                                                -bound, bound)
    return params


class HP:
    decoder_expand_dim = False
    dec_dim = 32
    dec_hidden_dim = 32
    n_layers = 3
    enc_dim = 16
    z_dim = 8
    truncated_max = 4.0  # TODO(synk): TruncatedStandardNormal is only used in inference(), not forward()
    z_proj = True
    conv_type = 0
    decoder_residual = True


if __name__ == "__main__":
    hp = HP()
    key = jax.random.PRNGKey(0)
    k_param, k_x, k_src, k_cond, k_eps = jax.random.split(key, 5)

    params = init_params(k_param, hp)

    B, L = 2, 16
    x = jax.random.normal(k_x, (B, hp.dec_dim, L), jnp.float32)      # NCL like PyTorch
    src = jax.random.normal(k_src, (B, hp.enc_dim, L), jnp.float32)  # NCL
    cond = jax.random.normal(k_cond, (B, hp.dec_dim, L), jnp.float32)
    eps = jax.random.normal(k_eps, (B, L, hp.z_dim), jnp.float32)    # reparam noise

    forward = make_forward(hp)
    y, kl = forward(params, x, src, cond, eps)
    jax.block_until_ready((y, kl))

    assert y.shape == (B, hp.dec_dim, L), y.shape
    assert kl.shape == (B, hp.z_dim, L), kl.shape
    assert bool(jnp.all(jnp.isfinite(y))) and bool(jnp.all(jnp.isfinite(kl)))
    # KL(q || N(0,1)) is analytically non-negative -- cheap sanity check on the
    # fused KL/sample epilogue.
    assert bool(jnp.all(kl >= -1e-5))
    print("KERNEL_OK")
</pallas_src>

<mosaic_0001>
module attributes {stable_mosaic.version = 11 : i64} {
  func.func @_decoder_block_kernel(%arg0: memref<32x32xf32, #tpu.memory_space<vmem>>, %arg1: memref<32x32xf32, #tpu.memory_space<vmem>>, %arg2: memref<32x16xf32, #tpu.memory_space<vmem>>, %arg3: memref<32x8xf32, #tpu.memory_space<vmem>>, %arg4: memref<32x1xf32, #tpu.memory_space<vmem>>, %arg5: memref<32x1xf32, #tpu.memory_space<vmem>>, %arg6: memref<32x32xf32, #tpu.memory_space<vmem>>, %arg7: memref<16x32xf32, #tpu.memory_space<vmem>>, %arg8: memref<1x32xf32, #tpu.memory_space<vmem>>, %arg9: memref<1x32xf32, #tpu.memory_space<vmem>>, %arg10: memref<32x32xf32, #tpu.memory_space<vmem>>, %arg11: memref<32x32xf32, #tpu.memory_space<vmem>>, %arg12: memref<32x32xf32, #tpu.memory_space<vmem>>, %arg13: memref<1x32xf32, #tpu.memory_space<vmem>>, %arg14: memref<1x32xf32, #tpu.memory_space<vmem>>, %arg15: memref<32x32xf32, #tpu.memory_space<vmem>>, %arg16: memref<32x32xf32, #tpu.memory_space<vmem>>, %arg17: memref<32x32xf32, #tpu.memory_space<vmem>>, %arg18: memref<1x32xf32, #tpu.memory_space<vmem>>, %arg19: memref<1x32xf32, #tpu.memory_space<vmem>>, %arg20: memref<32x8xf32, #tpu.memory_space<vmem>>, %arg21: memref<1x8xf32, #tpu.memory_space<vmem>>, %arg22: memref<32x8xf32, #tpu.memory_space<vmem>>, %arg23: memref<1x8xf32, #tpu.memory_space<vmem>>, %arg24: memref<8x32xf32, #tpu.memory_space<vmem>>, %arg25: memref<1x32xf32, #tpu.memory_space<vmem>>, %arg26: memref<32x32xf32, #tpu.memory_space<vmem>>, %arg27: memref<1x32xf32, #tpu.memory_space<vmem>>, %arg28: memref<1x32xf32, #tpu.memory_space<vmem>>, %arg29: memref<32x32xf32, #tpu.memory_space<vmem>>, %arg30: memref<32x32xf32, #tpu.memory_space<vmem>>, %arg31: memref<32x32xf32, #tpu.memory_space<vmem>>, %arg32: memref<1x32xf32, #tpu.memory_space<vmem>>, %arg33: memref<1x32xf32, #tpu.memory_space<vmem>>, %arg34: memref<32x32xf32, #tpu.memory_space<vmem>>, %arg35: memref<32x32xf32, #tpu.memory_space<vmem>>, %arg36: memref<32x32xf32, #tpu.memory_space<vmem>>, %arg37: memref<1x32xf32, #tpu.memory_space<vmem>>, %arg38: memref<1x32xf32, #tpu.memory_space<vmem>>, %arg39: memref<32x32xf32, #tpu.memory_space<vmem>>, %arg40: memref<1x32xf32, #tpu.memory_space<vmem>>, %arg41: memref<32x128xf32, #tpu.memory_space<vmem>>) attributes {dimension_semantics = [], scalar_prefetch = 0 : i64, scratch_operands = 0 : i64, tpu.core_type = #tpu.core_type<tc>} {
    %c0 = arith.constant 0 : index
    %c0_0 = arith.constant 0 : index
    %0 = vector.load %arg4[%c0, %c0_0] : memref<32x1xf32, #tpu.memory_space<vmem>>, vector<32x1xf32>
    %c0_1 = arith.constant 0 : index
    %c0_2 = arith.constant 0 : index
    %1 = vector.load %arg5[%c0_1, %c0_2] : memref<32x1xf32, #tpu.memory_space<vmem>>, vector<32x1xf32>
    %c0_3 = arith.constant 0 : index
    %c0_4 = arith.constant 0 : index
    %2 = vector.load %arg1[%c0_3, %c0_4] : memref<32x32xf32, #tpu.memory_space<vmem>>, vector<32x32xf32>
    %c0_5 = arith.constant 0 : index
    %c0_6 = arith.constant 0 : index
    %3 = vector.load %arg2[%c0_5, %c0_6] : memref<32x16xf32, #tpu.memory_space<vmem>>, vector<32x16xf32>
    %c0_7 = arith.constant 0 : index
    %c0_8 = arith.constant 0 : index
    %4 = vector.load %arg0[%c0_7, %c0_8] : memref<32x32xf32, #tpu.memory_space<vmem>>, vector<32x32xf32>
    %5 = arith.addf %4, %2 : vector<32x32xf32>
    %c0_9 = arith.constant 0 : index
    %c0_10 = arith.constant 0 : index
    %6 = vector.load %arg6[%c0_9, %c0_10] : memref<32x32xf32, #tpu.memory_space<vmem>>, vector<32x32xf32>
    %c0_11 = arith.constant 0 : index
    %c0_12 = arith.constant 0 : index
    %7 = vector.load %arg7[%c0_11, %c0_12] : memref<16x32xf32, #tpu.memory_space<vmem>>, vector<16x32xf32>
    %c0_13 = arith.constant 0 : index
    %c0_14 = arith.constant 0 : index
    %8 = vector.load %arg8[%c0_13, %c0_14] : memref<1x32xf32, #tpu.memory_space<vmem>>, vector<1x32xf32>
    %c0_15 = arith.constant 0 : index
    %c0_16 = arith.constant 0 : index
    %9 = vector.load %arg9[%c0_15, %c0_16] : memref<1x32xf32, #tpu.memory_space<vmem>>, vector<1x32xf32>
    %c0_17 = arith.constant 0 : index
    %c0_18 = arith.constant 0 : index
    %10 = vector.load %arg10[%c0_17, %c0_18] : memref<32x32xf32, #tpu.memory_space<vmem>>, vector<32x32xf32>
    %c0_19 = arith.constant 0 : index
    %c0_20 = arith.constant 0 : index
    %11 = vector.load %arg11[%c0_19, %c0_20] : memref<32x32xf32, #tpu.memory_space<vmem>>, vector<32x32xf32>
    %c0_21 = arith.constant 0 : index
    %c0_22 = arith.constant 0 : index
    %12 = vector.load %arg12[%c0_21, %c0_22] : memref<32x32xf32, #tpu.memory_space<vmem>>, vector<32x32xf32>
    %c0_23 = arith.constant 0 : index
    %c0_24 = arith.constant 0 : index
    %13 = vector.load %arg13[%c0_23, %c0_24] : memref<1x32xf32, #tpu.memory_space<vmem>>, vector<1x32xf32>
    %c0_25 = arith.constant 0 : index
    %c0_26 = arith.constant 0 : index
    %14 = vector.load %arg14[%c0_25, %c0_26] : memref<1x32xf32, #tpu.memory_space<vmem>>, vector<1x32xf32>
    %c0_27 = arith.constant 0 : index
    %c0_28 = arith.constant 0 : index
    %15 = vector.load %arg15[%c0_27, %c0_28] : memref<32x32xf32, #tpu.memory_space<vmem>>, vector<32x32xf32>
    %c0_29 = arith.constant 0 : index
    %c0_30 = arith.constant 0 : index
    %16 = vector.load %arg16[%c0_29, %c0_30] : memref<32x32xf32, #tpu.memory_space<vmem>>, vector<32x32xf32>
    %c0_31 = arith.constant 0 : index
    %c0_32 = arith.constant 0 : index
    %17 = vector.load %arg17[%c0_31, %c0_32] : memref<32x32xf32, #tpu.memory_space<vmem>>, vector<32x32xf32>
    %c0_33 = arith.constant 0 : index
    %c0_34 = arith.constant 0 : index
    %18 = vector.load %arg18[%c0_33, %c0_34] : memref<1x32xf32, #tpu.memory_space<vmem>>, vector<1x32xf32>
    %c0_35 = arith.constant 0 : index
    %c0_36 = arith.constant 0 : index
    %19 = vector.load %arg19[%c0_35, %c0_36] : memref<1x32xf32, #tpu.memory_space<vmem>>, vector<1x32xf32>
    %c0_37 = arith.constant 0 : index
    %c0_38 = arith.constant 0 : index
    %20 = vector.load %arg20[%c0_37, %c0_38] : memref<32x8xf32, #tpu.memory_space<vmem>>, vector<32x8xf32>
    %c0_39 = arith.constant 0 : index
    %c0_40 = arith.constant 0 : index
    %21 = vector.load %arg21[%c0_39, %c0_40] : memref<1x8xf32, #tpu.memory_space<vmem>>, vector<1x8xf32>
    %c0_41 = arith.constant 0 : index
    %c0_42 = arith.constant 0 : index
    %22 = vector.load %arg22[%c0_41, %c0_42] : memref<32x8xf32, #tpu.memory_space<vmem>>, vector<32x8xf32>
    %c0_43 = arith.constant 0 : index
    %c0_44 = arith.constant 0 : index
    %23 = vector.load %arg23[%c0_43, %c0_44] : memref<1x8xf32, #tpu.memory_space<vmem>>, vector<1x8xf32>
    %c0_45 = arith.constant 0 : index
    %c0_46 = arith.constant 0 : index
    %24 = vector.load %arg24[%c0_45, %c0_46] : memref<8x32xf32, #tpu.memory_space<vmem>>, vector<8x32xf32>
    %c0_47 = arith.constant 0 : index
    %c0_48 = arith.constant 0 : index
    %25 = vector.load %arg25[%c0_47, %c0_48] : memref<1x32xf32, #tpu.memory_space<vmem>>, vector<1x32xf32>
    %c0_49 = arith.constant 0 : index
    %c0_50 = arith.constant 0 : index
    %26 = vector.load %arg26[%c0_49, %c0_50] : memref<32x32xf32, #tpu.memory_space<vmem>>, vector<32x32xf32>
    %c0_51 = arith.constant 0 : index
    %c0_52 = arith.constant 0 : index
    %27 = vector.load %arg27[%c0_51, %c0_52] : memref<1x32xf32, #tpu.memory_space<vmem>>, vector<1x32xf32>
    %c0_53 = arith.constant 0 : index
    %c0_54 = arith.constant 0 : index
    %28 = vector.load %arg28[%c0_53, %c0_54] : memref<1x32xf32, #tpu.memory_space<vmem>>, vector<1x32xf32>
    %c0_55 = arith.constant 0 : index
    %c0_56 = arith.constant 0 : index
    %29 = vector.load %arg29[%c0_55, %c0_56] : memref<32x32xf32, #tpu.memory_space<vmem>>, vector<32x32xf32>
    %c0_57 = arith.constant 0 : index
    %c0_58 = arith.constant 0 : index
    %30 = vector.load %arg30[%c0_57, %c0_58] : memref<32x32xf32, #tpu.memory_space<vmem>>, vector<32x32xf32>
    %c0_59 = arith.constant 0 : index
    %c0_60 = arith.constant 0 : index
    %31 = vector.load %arg31[%c0_59, %c0_60] : memref<32x32xf32, #tpu.memory_space<vmem>>, vector<32x32xf32>
    %c0_61 = arith.constant 0 : index
    %c0_62 = arith.constant 0 : index
    %32 = vector.load %arg32[%c0_61, %c0_62] : memref<1x32xf32, #tpu.memory_space<vmem>>, vector<1x32xf32>
    %c0_63 = arith.constant 0 : index
    %c0_64 = arith.constant 0 : index
    %33 = vector.load %arg33[%c0_63, %c0_64] : memref<1x32xf32, #tpu.memory_space<vmem>>, vector<1x32xf32>
    %c0_65 = arith.constant 0 : index
    %c0_66 = arith.constant 0 : index
    %34 = vector.load %arg34[%c0_65, %c0_66] : memref<32x32xf32, #tpu.memory_space<vmem>>, vector<32x32xf32>
    %c0_67 = arith.constant 0 : index
    %c0_68 = arith.constant 0 : index
    %35 = vector.load %arg35[%c0_67, %c0_68] : memref<32x32xf32, #tpu.memory_space<vmem>>, vector<32x32xf32>
    %c0_69 = arith.constant 0 : index
    %c0_70 = arith.constant 0 : index
    %36 = vector.load %arg36[%c0_69, %c0_70] : memref<32x32xf32, #tpu.memory_space<vmem>>, vector<32x32xf32>
    %c0_71 = arith.constant 0 : index
    %c0_72 = arith.constant 0 : index
    %37 = vector.load %arg37[%c0_71, %c0_72] : memref<1x32xf32, #tpu.memory_space<vmem>>, vector<1x32xf32>
    %c0_73 = arith.constant 0 : index
    %c0_74 = arith.constant 0 : index
    %38 = vector.load %arg38[%c0_73, %c0_74] : memref<1x32xf32, #tpu.memory_space<vmem>>, vector<1x32xf32>
    %c0_75 = arith.constant 0 : index
    %c0_76 = arith.constant 0 : index
    %39 = vector.load %arg39[%c0_75, %c0_76] : memref<32x32xf32, #tpu.memory_space<vmem>>, vector<32x32xf32>
    %c0_77 = arith.constant 0 : index
    %c0_78 = arith.constant 0 : index
    %40 = vector.load %arg40[%c0_77, %c0_78] : memref<1x32xf32, #tpu.memory_space<vmem>>, vector<1x32xf32>
    %cst = arith.constant dense<0.000000e+00> : vector<32x32xf32>
    %41 = tpu.matmul %5, %6, %cst {dimension_numbers = #tpu.dot_dimension_numbers<[1], [0], [0], [1], [0, 0, 1, 1], [], []>} : vector<32x32xf32>, vector<32x32xf32>, vector<32x32xf32> -> vector<32x32xf32>
    %cst_79 = arith.constant dense<0.000000e+00> : vector<32x32xf32>
    %42 = tpu.matmul %3, %7, %cst_79 {dimension_numbers = #tpu.dot_dimension_numbers<[1], [0], [0], [1], [0, 0, 1, 1], [], []>} : vector<32x16xf32>, vector<16x32xf32>, vector<32x32xf32> -> vector<32x32xf32>
    %43 = arith.addf %41, %42 : vector<32x32xf32>
    %cst_80 = arith.constant dense<0.000000e+00> : vector<32xf32>
    %44 = vector.multi_reduction <add>, %43, %cst_80 [0] : vector<32x32xf32> to vector<32xf32>
    %45 = vector.shape_cast %44 : vector<32xf32> to vector<1x32xf32>
    %cst_81 = arith.constant 3.125000e-02 : f32
    %46 = vector.broadcast %cst_81 : f32 to vector<1x32xf32>
    %47 = arith.mulf %45, %46 : vector<1x32xf32>
    %48 = arith.mulf %43, %43 : vector<32x32xf32>
    %cst_82 = arith.constant dense<0.000000e+00> : vector<32xf32>
    %49 = vector.multi_reduction <add>, %48, %cst_82 [0] : vector<32x32xf32> to vector<32xf32>
    %50 = vector.shape_cast %49 : vector<32xf32> to vector<1x32xf32>
    %cst_83 = arith.constant 3.125000e-02 : f32
    %51 = vector.broadcast %cst_83 : f32 to vector<1x32xf32>
    %52 = arith.mulf %50, %51 : vector<1x32xf32>
    %53 = arith.mulf %47, %47 : vector<1x32xf32>
    %54 = arith.subf %52, %53 : vector<1x32xf32>
    %cst_84 = arith.constant 0.000000e+00 : f32
    %55 = vector.broadcast %cst_84 : f32 to vector<1x32xf32>
    %56 = arith.maximumf %54, %55 : vector<1x32xf32>
    %cst_85 = arith.constant 9.99999974E-6 : f32
    %57 = vector.broadcast %cst_85 : f32 to vector<1x32xf32>
    %58 = arith.addf %56, %57 : vector<1x32xf32>
    %59 = math.rsqrt %58 : vector<1x32xf32>
    %60 = arith.mulf %8, %59 : vector<1x32xf32>
    %61 = arith.mulf %47, %60 : vector<1x32xf32>
    %62 = arith.subf %9, %61 : vector<1x32xf32>
    %63 = vector.broadcast %60 : vector<1x32xf32> to vector<32x32xf32>
    %64 = arith.mulf %43, %63 : vector<32x32xf32>
    %65 = vector.broadcast %62 : vector<1x32xf32> to vector<32x32xf32>
    %66 = arith.addf %64, %65 : vector<32x32xf32>
    %cst_86 = arith.constant 5.000000e-01 : f32
    %67 = vector.broadcast %cst_86 : f32 to vector<32x32xf32>
    %68 = arith.mulf %67, %66 : vector<32x32xf32>
    %cst_87 = arith.constant 4.471500e-02 : f32
    %69 = vector.broadcast %cst_87 : f32 to vector<32x32xf32>
    %70 = arith.mulf %69, %66 : vector<32x32xf32>
    %71 = arith.mulf %70, %66 : vector<32x32xf32>
    %72 = arith.mulf %71, %66 : vector<32x32xf32>
    %73 = arith.addf %66, %72 : vector<32x32xf32>
    %cst_88 = arith.constant 0.797884583 : f32
    %74 = vector.broadcast %cst_88 : f32 to vector<32x32xf32>
    %75 = arith.mulf %74, %73 : vector<32x32xf32>
    %76 = math.tanh %75 : vector<32x32xf32>
    %cst_89 = arith.constant 1.000000e+00 : f32
    %77 = vector.broadcast %cst_89 : f32 to vector<32x32xf32>
    %78 = arith.addf %77, %76 : vector<32x32xf32>
    %79 = arith.mulf %68, %78 : vector<32x32xf32>
    %c1_i32 = arith.constant 1 : i32
    %80 = tpu.dynamic_rotate %79 by %c1_i32 dim 0 : vector<32x32xf32>, i32 -> vector<32x32xf32>
    %81 = vector.broadcast %0 : vector<32x1xf32> to vector<32x32xf32>
    %82 = arith.mulf %80, %81 : vector<32x32xf32>
    %c31_i32 = arith.constant 31 : i32
    %83 = tpu.dynamic_rotate %79 by %c31_i32 dim 0 : vector<32x32xf32>, i32 -> vector<32x32xf32>
    %84 = vector.broadcast %1 : vector<32x1xf32> to vector<32x32xf32>
    %85 = arith.mulf %83, %84 : vector<32x32xf32>
    %cst_90 = arith.constant dense<0.000000e+00> : vector<32x32xf32>
    %86 = tpu.matmul %82, %10, %cst_90 {dimension_numbers = #tpu.dot_dimension_numbers<[1], [0], [0], [1], [0, 0, 1, 1], [], []>} : vector<32x32xf32>, vector<32x32xf32>, vector<32x32xf32> -> vector<32x32xf32>
    %cst_91 = arith.constant dense<0.000000e+00> : vector<32x32xf32>
    %87 = tpu.matmul %79, %11, %cst_91 {dimension_numbers = #tpu.dot_dimension_numbers<[1], [0], [0], [1], [0, 0, 1, 1], [], []>} : vector<32x32xf32>, vector<32x32xf32>, vector<32x32xf32> -> vector<32x32xf32>
    %88 = arith.addf %86, %87 : vector<32x32xf32>
    %cst_92 = arith.constant dense<0.000000e+00> : vector<32x32xf32>
    %89 = tpu.matmul %85, %12, %cst_92 {dimension_numbers = #tpu.dot_dimension_numbers<[1], [0], [0], [1], [0, 0, 1, 1], [], []>} : vector<32x32xf32>, vector<32x32xf32>, vector<32x32xf32> -> vector<32x32xf32>
    %90 = arith.addf %88, %89 : vector<32x32xf32>
    %cst_93 = arith.constant dense<0.000000e+00> : vector<32xf32>
    %91 = vector.multi_reduction <add>, %90, %cst_93 [0] : vector<32x32xf32> to vector<32xf32>
    %92 = vector.shape_cast %91 : vector<32xf32> to vector<1x32xf32>
    %cst_94 = arith.constant 3.125000e-02 : f32
    %93 = vector.broadcast %cst_94 : f32 to vector<1x32xf32>
    %94 = arith.mulf %92, %93 : vector<1x32xf32>
    %95 = arith.mulf %90, %90 : vector<32x32xf32>
    %cst_95 = arith.constant dense<0.000000e+00> : vector<32xf32>
    %96 = vector.multi_reduction <add>, %95, %cst_95 [0] : vector<32x32xf32> to vector<32xf32>
    %97 = vector.shape_cast %96 : vector<32xf32> to vector<1x32xf32>
    %cst_96 = arith.constant 3.125000e-02 : f32
    %98 = vector.broadcast %cst_96 : f32 to vector<1x32xf32>
    %99 = arith.mulf %97, %98 : vector<1x32xf32>
    %100 = arith.mulf %94, %94 : vector<1x32xf32>
    %101 = arith.subf %99, %100 : vector<1x32xf32>
    %cst_97 = arith.constant 0.000000e+00 : f32
    %102 = vector.broadcast %cst_97 : f32 to vector<1x32xf32>
    %103 = arith.maximumf %101, %102 : vector<1x32xf32>
    %cst_98 = arith.constant 9.99999974E-6 : f32
    %104 = vector.broadcast %cst_98 : f32 to vector<1x32xf32>
    %105 = arith.addf %103, %104 : vector<1x32xf32>
    %106 = math.rsqrt %105 : vector<1x32xf32>
    %107 = arith.mulf %13, %106 : vector<1x32xf32>
    %108 = arith.mulf %94, %107 : vector<1x32xf32>
    %109 = arith.subf %14, %108 : vector<1x32xf32>
    %110 = vector.broadcast %107 : vector<1x32xf32> to vector<32x32xf32>
    %111 = arith.mulf %90, %110 : vector<32x32xf32>
    %112 = vector.broadcast %109 : vector<1x32xf32> to vector<32x32xf32>
    %113 = arith.addf %111, %112 : vector<32x32xf32>
    %cst_99 = arith.constant 5.000000e-01 : f32
    %114 = vector.broadcast %cst_99 : f32 to vector<32x32xf32>
    %115 = arith.mulf %114, %113 : vector<32x32xf32>
    %cst_100 = arith.constant 4.471500e-02 : f32
    %116 = vector.broadcast %cst_100 : f32 to vector<32x32xf32>
    %117 = arith.mulf %116, %113 : vector<32x32xf32>
    %118 = arith.mulf %117, %113 : vector<32x32xf32>
    %119 = arith.mulf %118, %113 : vector<32x32xf32>
    %120 = arith.addf %113, %119 : vector<32x32xf32>
    %cst_101 = arith.constant 0.797884583 : f32
    %121 = vector.broadcast %cst_101 : f32 to vector<32x32xf32>
    %122 = arith.mulf %121, %120 : vector<32x32xf32>
    %123 = math.tanh %122 : vector<32x32xf32>
    %cst_102 = arith.constant 1.000000e+00 : f32
    %124 = vector.broadcast %cst_102 : f32 to vector<32x32xf32>
    %125 = arith.addf %124, %123 : vector<32x32xf32>
    %126 = arith.mulf %115, %125 : vector<32x32xf32>
    %c1_i32_103 = arith.constant 1 : i32
    %127 = tpu.dynamic_rotate %126 by %c1_i32_103 dim 0 : vector<32x32xf32>, i32 -> vector<32x32xf32>
    %128 = vector.broadcast %0 : vector<32x1xf32> to vector<32x32xf32>
    %129 = arith.mulf %127, %128 : vector<32x32xf32>
    %c31_i32_104 = arith.constant 31 : i32
    %130 = tpu.dynamic_rotate %126 by %c31_i32_104 dim 0 : vector<32x32xf32>, i32 -> vector<32x32xf32>
    %131 = vector.broadcast %1 : vector<32x1xf32> to vector<32x32xf32>
    %132 = arith.mulf %130, %131 : vector<32x32xf32>
    %cst_105 = arith.constant dense<0.000000e+00> : vector<32x32xf32>
    %133 = tpu.matmul %129, %15, %cst_105 {dimension_numbers = #tpu.dot_dimension_numbers<[1], [0], [0], [1], [0, 0, 1, 1], [], []>} : vector<32x32xf32>, vector<32x32xf32>, vector<32x32xf32> -> vector<32x32xf32>
    %cst_106 = arith.constant dense<0.000000e+00> : vector<32x32xf32>
    %134 = tpu.matmul %126, %16, %cst_106 {dimension_numbers = #tpu.dot_dimension_numbers<[1], [0], [0], [1], [0, 0, 1, 1], [], []>} : vector<32x32xf32>, vector<32x32xf32>, vector<32x32xf32> -> vector<32x32xf32>
    %135 = arith.addf %133, %134 : vector<32x32xf32>
    %cst_107 = arith.constant dense<0.000000e+00> : vector<32x32xf32>
    %136 = tpu.matmul %132, %17, %cst_107 {dimension_numbers = #tpu.dot_dimension_numbers<[1], [0], [0], [1], [0, 0, 1, 1], [], []>} : vector<32x32xf32>, vector<32x32xf32>, vector<32x32xf32> -> vector<32x32xf32>
    %137 = arith.addf %135, %136 : vector<32x32xf32>
    %cst_108 = arith.constant dense<0.000000e+00> : vector<32xf32>
    %138 = vector.multi_reduction <add>, %137, %cst_108 [0] : vector<32x32xf32> to vector<32xf32>
    %139 = vector.shape_cast %138 : vector<32xf32> to vector<1x32xf32>
    %cst_109 = arith.constant 3.125000e-02 : f32
    %140 = vector.broadcast %cst_109 : f32 to vector<1x32xf32>
    %141 = arith.mulf %139, %140 : vector<1x32xf32>
    %142 = arith.mulf %137, %137 : vector<32x32xf32>
    %cst_110 = arith.constant dense<0.000000e+00> : vector<32xf32>
    %143 = vector.multi_reduction <add>, %142, %cst_110 [0] : vector<32x32xf32> to vector<32xf32>
    %144 = vector.shape_cast %143 : vector<32xf32> to vector<1x32xf32>
    %cst_111 = arith.constant 3.125000e-02 : f32
    %145 = vector.broadcast %cst_111 : f32 to vector<1x32xf32>
    %146 = arith.mulf %144, %145 : vector<1x32xf32>
    %147 = arith.mulf %141, %141 : vector<1x32xf32>
    %148 = arith.subf %146, %147 : vector<1x32xf32>
    %cst_112 = arith.constant 0.000000e+00 : f32
    %149 = vector.broadcast %cst_112 : f32 to vector<1x32xf32>
    %150 = arith.maximumf %148, %149 : vector<1x32xf32>
    %cst_113 = arith.constant 9.99999974E-6 : f32
    %151 = vector.broadcast %cst_113 : f32 to vector<1x32xf32>
    %152 = arith.addf %150, %151 : vector<1x32xf32>
    %153 = math.rsqrt %152 : vector<1x32xf32>
    %154 = arith.mulf %18, %153 : vector<1x32xf32>
    %155 = arith.mulf %141, %154 : vector<1x32xf32>
    %156 = arith.subf %19, %155 : vector<1x32xf32>
    %157 = vector.broadcast %154 : vector<1x32xf32> to vector<32x32xf32>
    %158 = arith.mulf %137, %157 : vector<32x32xf32>
    %159 = vector.broadcast %156 : vector<1x32xf32> to vector<32x32xf32>
    %160 = arith.addf %158, %159 : vector<32x32xf32>
    %cst_114 = arith.constant 5.000000e-01 : f32
    %161 = vector.broadcast %cst_114 : f32 to vector<32x32xf32>
    %162 = arith.mulf %161, %160 : vector<32x32xf32>
    %cst_115 = arith.constant 4.471500e-02 : f32
    %163 = vector.broadcast %cst_115 : f32 to vector<32x32xf32>
    %164 = arith.mulf %163, %160 : vector<32x32xf32>
    %165 = arith.mulf %164, %160 : vector<32x32xf32>
    %166 = arith.mulf %165, %160 : vector<32x32xf32>
    %167 = arith.addf %160, %166 : vector<32x32xf32>
    %cst_116 = arith.constant 0.797884583 : f32
    %168 = vector.broadcast %cst_116 : f32 to vector<32x32xf32>
    %169 = arith.mulf %168, %167 : vector<32x32xf32>
    %170 = math.tanh %169 : vector<32x32xf32>
    %cst_117 = arith.constant 1.000000e+00 : f32
    %171 = vector.broadcast %cst_117 : f32 to vector<32x32xf32>
    %172 = arith.addf %171, %170 : vector<32x32xf32>
    %173 = arith.mulf %162, %172 : vector<32x32xf32>
    %cst_118 = arith.constant dense<0.000000e+00> : vector<32x8xf32>
    %174 = tpu.matmul %173, %20, %cst_118 {dimension_numbers = #tpu.dot_dimension_numbers<[1], [0], [0], [1], [0, 0, 1, 1], [], []>} : vector<32x32xf32>, vector<32x8xf32>, vector<32x8xf32> -> vector<32x8xf32>
    %175 = vector.broadcast %21 : vector<1x8xf32> to vector<32x8xf32>
    %176 = arith.addf %174, %175 : vector<32x8xf32>
    %cst_119 = arith.constant dense<0.000000e+00> : vector<32x8xf32>
    %177 = tpu.matmul %173, %22, %cst_119 {dimension_numbers = #tpu.dot_dimension_numbers<[1], [0], [0], [1], [0, 0, 1, 1], [], []>} : vector<32x32xf32>, vector<32x8xf32>, vector<32x8xf32> -> vector<32x8xf32>
    %178 = vector.broadcast %23 : vector<1x8xf32> to vector<32x8xf32>
    %179 = arith.addf %177, %178 : vector<32x8xf32>
    %180 = math.exp %179 : vector<32x8xf32>
    %cst_120 = arith.constant 0.000000e+00 : f32
    %181 = vector.broadcast %cst_120 : f32 to vector<32x8xf32>
    %182 = arith.subf %181, %179 : vector<32x8xf32>
    %183 = arith.mulf %180, %180 : vector<32x8xf32>
    %184 = arith.mulf %176, %176 : vector<32x8xf32>
    %185 = arith.addf %183, %184 : vector<32x8xf32>
    %cst_121 = arith.constant 5.000000e-01 : f32
    %186 = vector.broadcast %cst_121 : f32 to vector<32x8xf32>
    %187 = arith.mulf %186, %185 : vector<32x8xf32>
    %188 = arith.addf %182, %187 : vector<32x8xf32>
    %cst_122 = arith.constant 5.000000e-01 : f32
    %189 = vector.broadcast %cst_122 : f32 to vector<32x8xf32>
    %190 = arith.subf %188, %189 : vector<32x8xf32>
    %c0_123 = arith.constant 0 : index
    %c0_124 = arith.constant 0 : index
    %191 = vector.load %arg3[%c0_123, %c0_124] : memref<32x8xf32, #tpu.memory_space<vmem>>, vector<32x8xf32>
    %192 = arith.mulf %191, %180 : vector<32x8xf32>
    %193 = arith.addf %176, %192 : vector<32x8xf32>
    %cst_125 = arith.constant dense<0.000000e+00> : vector<32x32xf32>
    %194 = tpu.matmul %193, %24, %cst_125 {dimension_numbers = #tpu.dot_dimension_numbers<[1], [0], [0], [1], [0, 0, 1, 1], [], []>} : vector<32x8xf32>, vector<8x32xf32>, vector<32x32xf32> -> vector<32x32xf32>
    %195 = arith.addf %5, %194 : vector<32x32xf32>
    %196 = vector.broadcast %25 : vector<1x32xf32> to vector<32x32xf32>
    %197 = arith.addf %195, %196 : vector<32x32xf32>
    %cst_126 = arith.constant dense<0.000000e+00> : vector<32x32xf32>
    %198 = tpu.matmul %197, %26, %cst_126 {dimension_numbers = #tpu.dot_dimension_numbers<[1], [0], [0], [1], [0, 0, 1, 1], [], []>} : vector<32x32xf32>, vector<32x32xf32>, vector<32x32xf32> -> vector<32x32xf32>
    %cst_127 = arith.constant dense<0.000000e+00> : vector<32xf32>
    %199 = vector.multi_reduction <add>, %198, %cst_127 [0] : vector<32x32xf32> to vector<32xf32>
    %200 = vector.shape_cast %199 : vector<32xf32> to vector<1x32xf32>
    %cst_128 = arith.constant 3.125000e-02 : f32
    %201 = vector.broadcast %cst_128 : f32 to vector<1x32xf32>
    %202 = arith.mulf %200, %201 : vector<1x32xf32>
    %203 = arith.mulf %198, %198 : vector<32x32xf32>
    %cst_129 = arith.constant dense<0.000000e+00> : vector<32xf32>
    %204 = vector.multi_reduction <add>, %203, %cst_129 [0] : vector<32x32xf32> to vector<32xf32>
    %205 = vector.shape_cast %204 : vector<32xf32> to vector<1x32xf32>
    %cst_130 = arith.constant 3.125000e-02 : f32
    %206 = vector.broadcast %cst_130 : f32 to vector<1x32xf32>
    %207 = arith.mulf %205, %206 : vector<1x32xf32>
    %208 = arith.mulf %202, %202 : vector<1x32xf32>
    %209 = arith.subf %207, %208 : vector<1x32xf32>
    %cst_131 = arith.constant 0.000000e+00 : f32
    %210 = vector.broadcast %cst_131 : f32 to vector<1x32xf32>
    %211 = arith.maximumf %209, %210 : vector<1x32xf32>
    %cst_132 = arith.constant 9.99999974E-6 : f32
    %212 = vector.broadcast %cst_132 : f32 to vector<1x32xf32>
    %213 = arith.addf %211, %212 : vector<1x32xf32>
    %214 = math.rsqrt %213 : vector<1x32xf32>
    %215 = arith.mulf %27, %214 : vector<1x32xf32>
    %216 = arith.mulf %202, %215 : vector<1x32xf32>
    %217 = arith.subf %28, %216 : vector<1x32xf32>
    %218 = vector.broadcast %215 : vector<1x32xf32> to vector<32x32xf32>
    %219 = arith.mulf %198, %218 : vector<32x32xf32>
    %220 = vector.broadcast %217 : vector<1x32xf32> to vector<32x32xf32>
    %221 = arith.addf %219, %220 : vector<32x32xf32>
    %cst_133 = arith.constant 5.000000e-01 : f32
    %222 = vector.broadcast %cst_133 : f32 to vector<32x32xf32>
    %223 = arith.mulf %222, %221 : vector<32x32xf32>
    %cst_134 = arith.constant 4.471500e-02 : f32
    %224 = vector.broadcast %cst_134 : f32 to vector<32x32xf32>
    %225 = arith.mulf %224, %221 : vector<32x32xf32>
    %226 = arith.mulf %225, %221 : vector<32x32xf32>
    %227 = arith.mulf %226, %221 : vector<32x32xf32>
    %228 = arith.addf %221, %227 : vector<32x32xf32>
    %cst_135 = arith.constant 0.797884583 : f32
    %229 = vector.broadcast %cst_135 : f32 to vector<32x32xf32>
    %230 = arith.mulf %229, %228 : vector<32x32xf32>
    %231 = math.tanh %230 : vector<32x32xf32>
    %cst_136 = arith.constant 1.000000e+00 : f32
    %232 = vector.broadcast %cst_136 : f32 to vector<32x32xf32>
    %233 = arith.addf %232, %231 : vector<32x32xf32>
    %234 = arith.mulf %223, %233 : vector<32x32xf32>
    %c1_i32_137 = arith.constant 1 : i32
    %235 = tpu.dynamic_rotate %234 by %c1_i32_137 dim 0 : vector<32x32xf32>, i32 -> vector<32x32xf32>
    %236 = vector.broadcast %0 : vector<32x1xf32> to vector<32x32xf32>
    %237 = arith.mulf %235, %236 : vector<32x32xf32>
    %c31_i32_138 = arith.constant 31 : i32
    %238 = tpu.dynamic_rotate %234 by %c31_i32_138 dim 0 : vector<32x32xf32>, i32 -> vector<32x32xf32>
    %239 = vector.broadcast %1 : vector<32x1xf32> to vector<32x32xf32>
    %240 = arith.mulf %238, %239 : vector<32x32xf32>
    %cst_139 = arith.constant dense<0.000000e+00> : vector<32x32xf32>
    %241 = tpu.matmul %237, %29, %cst_139 {dimension_numbers = #tpu.dot_dimension_numbers<[1], [0], [0], [1], [0, 0, 1, 1], [], []>} : vector<32x32xf32>, vector<32x32xf32>, vector<32x32xf32> -> vector<32x32xf32>
    %cst_140 = arith.constant dense<0.000000e+00> : vector<32x32xf32>
    %242 = tpu.matmul %234, %30, %cst_140 {dimension_numbers = #tpu.dot_dimension_numbers<[1], [0], [0], [1], [0, 0, 1, 1], [], []>} : vector<32x32xf32>, vector<32x32xf32>, vector<32x32xf32> -> vector<32x32xf32>
    %243 = arith.addf %241, %242 : vector<32x32xf32>
    %cst_141 = arith.constant dense<0.000000e+00> : vector<32x32xf32>
    %244 = tpu.matmul %240, %31, %cst_141 {dimension_numbers = #tpu.dot_dimension_numbers<[1], [0], [0], [1], [0, 0, 1, 1], [], []>} : vector<32x32xf32>, vector<32x32xf32>, vector<32x32xf32> -> vector<32x32xf32>
    %245 = arith.addf %243, %244 : vector<32x32xf32>
    %cst_142 = arith.constant dense<0.000000e+00> : vector<32xf32>
    %246 = vector.multi_reduction <add>, %245, %cst_142 [0] : vector<32x32xf32> to vector<32xf32>
    %247 = vector.shape_cast %246 : vector<32xf32> to vector<1x32xf32>
    %cst_143 = arith.constant 3.125000e-02 : f32
    %248 = vector.broadcast %cst_143 : f32 to vector<1x32xf32>
    %249 = arith.mulf %247, %248 : vector<1x32xf32>
    %250 = arith.mulf %245, %245 : vector<32x32xf32>
    %cst_144 = arith.constant dense<0.000000e+00> : vector<32xf32>
    %251 = vector.multi_reduction <add>, %250, %cst_144 [0] : vector<32x32xf32> to vector<32xf32>
    %252 = vector.shape_cast %251 : vector<32xf32> to vector<1x32xf32>
    %cst_145 = arith.constant 3.125000e-02 : f32
    %253 = vector.broadcast %cst_145 : f32 to vector<1x32xf32>
    %254 = arith.mulf %252, %253 : vector<1x32xf32>
    %255 = arith.mulf %249, %249 : vector<1x32xf32>
    %256 = arith.subf %254, %255 : vector<1x32xf32>
    %cst_146 = arith.constant 0.000000e+00 : f32
    %257 = vector.broadcast %cst_146 : f32 to vector<1x32xf32>
    %258 = arith.maximumf %256, %257 : vector<1x32xf32>
    %cst_147 = arith.constant 9.99999974E-6 : f32
    %259 = vector.broadcast %cst_147 : f32 to vector<1x32xf32>
    %260 = arith.addf %258, %259 : vector<1x32xf32>
    %261 = math.rsqrt %260 : vector<1x32xf32>
    %262 = arith.mulf %32, %261 : vector<1x32xf32>
    %263 = arith.mulf %249, %262 : vector<1x32xf32>
    %264 = arith.subf %33, %263 : vector<1x32xf32>
    %265 = vector.broadcast %262 : vector<1x32xf32> to vector<32x32xf32>
    %266 = arith.mulf %245, %265 : vector<32x32xf32>
    %267 = vector.broadcast %264 : vector<1x32xf32> to vector<32x32xf32>
    %268 = arith.addf %266, %267 : vector<32x32xf32>
    %cst_148 = arith.constant 5.000000e-01 : f32
    %269 = vector.broadcast %cst_148 : f32 to vector<32x32xf32>
    %270 = arith.mulf %269, %268 : vector<32x32xf32>
    %cst_149 = arith.constant 4.471500e-02 : f32
    %271 = vector.broadcast %cst_149 : f32 to vector<32x32xf32>
    %272 = arith.mulf %271, %268 : vector<32x32xf32>
    %273 = arith.mulf %272, %268 : vector<32x32xf32>
    %274 = arith.mulf %273, %268 : vector<32x32xf32>
    %275 = arith.addf %268, %274 : vector<32x32xf32>
    %cst_150 = arith.constant 0.797884583 : f32
    %276 = vector.broadcast %cst_150 : f32 to vector<32x32xf32>
    %277 = arith.mulf %276, %275 : vector<32x32xf32>
    %278 = math.tanh %277 : vector<32x32xf32>
    %cst_151 = arith.constant 1.000000e+00 : f32
    %279 = vector.broadcast %cst_151 : f32 to vector<32x32xf32>
    %280 = arith.addf %279, %278 : vector<32x32xf32>
    %281 = arith.mulf %270, %280 : vector<32x32xf32>
    %c1_i32_152 = arith.constant 1 : i32
    %282 = tpu.dynamic_rotate %281 by %c1_i32_152 dim 0 : vector<32x32xf32>, i32 -> vector<32x32xf32>
    %283 = vector.broadcast %0 : vector<32x1xf32> to vector<32x32xf32>
    %284 = arith.mulf %282, %283 : vector<32x32xf32>
    %c31_i32_153 = arith.constant 31 : i32
    %285 = tpu.dynamic_rotate %281 by %c31_i32_153 dim 0 : vector<32x32xf32>, i32 -> vector<32x32xf32>
    %286 = vector.broadcast %1 : vector<32x1xf32> to vector<32x32xf32>
    %287 = arith.mulf %285, %286 : vector<32x32xf32>
    %cst_154 = arith.constant dense<0.000000e+00> : vector<32x32xf32>
    %288 = tpu.matmul %284, %34, %cst_154 {dimension_numbers = #tpu.dot_dimension_numbers<[1], [0], [0], [1], [0, 0, 1, 1], [], []>} : vector<32x32xf32>, vector<32x32xf32>, vector<32x32xf32> -> vector<32x32xf32>
    %cst_155 = arith.constant dense<0.000000e+00> : vector<32x32xf32>
    %289 = tpu.matmul %281, %35, %cst_155 {dimension_numbers = #tpu.dot_dimension_numbers<[1], [0], [0], [1], [0, 0, 1, 1], [], []>} : vector<32x32xf32>, vector<32x32xf32>, vector<32x32xf32> -> vector<32x32xf32>
    %290 = arith.addf %288, %289 : vector<32x32xf32>
    %cst_156 = arith.constant dense<0.000000e+00> : vector<32x32xf32>
    %291 = tpu.matmul %287, %36, %cst_156 {dimension_numbers = #tpu.dot_dimension_numbers<[1], [0], [0], [1], [0, 0, 1, 1], [], []>} : vector<32x32xf32>, vector<32x32xf32>, vector<32x32xf32> -> vector<32x32xf32>
    %292 = arith.addf %290, %291 : vector<32x32xf32>
    %cst_157 = arith.constant dense<0.000000e+00> : vector<32xf32>
    %293 = vector.multi_reduction <add>, %292, %cst_157 [0] : vector<32x32xf32> to vector<32xf32>
    %294 = vector.shape_cast %293 : vector<32xf32> to vector<1x32xf32>
    %cst_158 = arith.constant 3.125000e-02 : f32
    %295 = vector.broadcast %cst_158 : f32 to vector<1x32xf32>
    %296 = arith.mulf %294, %295 : vector<1x32xf32>
    %297 = arith.mulf %292, %292 : vector<32x32xf32>
    %cst_159 = arith.constant dense<0.000000e+00> : vector<32xf32>
    %298 = vector.multi_reduction <add>, %297, %cst_159 [0] : vector<32x32xf32> to vector<32xf32>
    %299 = vector.shape_cast %298 : vector<32xf32> to vector<1x32xf32>
    %cst_160 = arith.constant 3.125000e-02 : f32
    %300 = vector.broadcast %cst_160 : f32 to vector<1x32xf32>
    %301 = arith.mulf %299, %300 : vector<1x32xf32>
    %302 = arith.mulf %296, %296 : vector<1x32xf32>
    %303 = arith.subf %301, %302 : vector<1x32xf32>
    %cst_161 = arith.constant 0.000000e+00 : f32
    %304 = vector.broadcast %cst_161 : f32 to vector<1x32xf32>
    %305 = arith.maximumf %303, %304 : vector<1x32xf32>
    %cst_162 = arith.constant 9.99999974E-6 : f32
    %306 = vector.broadcast %cst_162 : f32 to vector<1x32xf32>
    %307 = arith.addf %305, %306 : vector<1x32xf32>
    %308 = math.rsqrt %307 : vector<1x32xf32>
    %309 = arith.mulf %37, %308 : vector<1x32xf32>
    %310 = arith.mulf %296, %309 : vector<1x32xf32>
    %311 = arith.subf %38, %310 : vector<1x32xf32>
    %312 = vector.broadcast %309 : vector<1x32xf32> to vector<32x32xf32>
    %313 = arith.mulf %292, %312 : vector<32x32xf32>
    %314 = vector.broadcast %311 : vector<1x32xf32> to vector<32x32xf32>
    %315 = arith.addf %313, %314 : vector<32x32xf32>
    %cst_163 = arith.constant 5.000000e-01 : f32
    %316 = vector.broadcast %cst_163 : f32 to vector<32x32xf32>
    %317 = arith.mulf %316, %315 : vector<32x32xf32>
    %cst_164 = arith.constant 4.471500e-02 : f32
    %318 = vector.broadcast %cst_164 : f32 to vector<32x32xf32>
    %319 = arith.mulf %318, %315 : vector<32x32xf32>
    %320 = arith.mulf %319, %315 : vector<32x32xf32>
    %321 = arith.mulf %320, %315 : vector<32x32xf32>
    %322 = arith.addf %315, %321 : vector<32x32xf32>
    %cst_165 = arith.constant 0.797884583 : f32
    %323 = vector.broadcast %cst_165 : f32 to vector<32x32xf32>
    %324 = arith.mulf %323, %322 : vector<32x32xf32>
    %325 = math.tanh %324 : vector<32x32xf32>
    %cst_166 = arith.constant 1.000000e+00 : f32
    %326 = vector.broadcast %cst_166 : f32 to vector<32x32xf32>
    %327 = arith.addf %326, %325 : vector<32x32xf32>
    %328 = arith.mulf %317, %327 : vector<32x32xf32>
    %cst_167 = arith.constant dense<0.000000e+00> : vector<32x32xf32>
    %329 = tpu.matmul %328, %39, %cst_167 {dimension_numbers = #tpu.dot_dimension_numbers<[1], [0], [0], [1], [0, 0, 1, 1], [], []>} : vector<32x32xf32>, vector<32x32xf32>, vector<32x32xf32> -> vector<32x32xf32>
    %330 = vector.broadcast %40 : vector<1x32xf32> to vector<32x32xf32>
    %331 = arith.addf %329, %330 : vector<32x32xf32>
    %332 = arith.addf %4, %331 : vector<32x32xf32>
    %cst_168 = arith.constant 0.000000e+00 : f32
    %333 = vector.broadcast %cst_168 : f32 to vector<32x128xf32>
    %c0_169 = arith.constant 0 : index
    %c0_170 = arith.constant 0 : index
    %334 = vector.load %arg41[%c0_169, %c0_170] : memref<32x128xf32, #tpu.memory_space<vmem>>, vector<32x128xf32>
    tpu.vector_store %arg41[%c0_169, %c0_170], %333 {strides = array<i32>} : memref<32x128xf32, #tpu.memory_space<vmem>>, vector<32x128xf32>,
    %c0_171 = arith.constant 0 : index
    %c0_172 = arith.constant 0 : index
    %335 = vector.load %arg41[%c0_171, %c0_172] : memref<32x128xf32, #tpu.memory_space<vmem>>, vector<32x32xf32>
    tpu.vector_store %arg41[%c0_171, %c0_172], %332 {strides = array<i32>} : memref<32x128xf32, #tpu.memory_space<vmem>>, vector<32x32xf32>,
    %c0_173 = arith.constant 0 : index
    %c32 = arith.constant 32 : index
    %336 = vector.load %arg41[%c0_173, %c32] : memref<32x128xf32, #tpu.memory_space<vmem>>, vector<32x8xf32>
    tpu.vector_store %arg41[%c0_173, %c32], %190 {strides = array<i32>} : memref<32x128xf32, #tpu.memory_space<vmem>>, vector<32x8xf32>,
    return
  }
}

</mosaic_0001>

<bundles_post_ra>
// kernel: forward.1
= control target key start
LH: loop header
LB: loop body
LE: loop exit
PB: predicated region body
PF: predicated region fallthrough
CT: control target
= control target key end

     0   :  { %s3785_s3 = smov 7   ;;  %s3786_s7 = smov 2   ;;  %v3787_v0 = vmov 0   ;;  %vm281_vm0 = vcmask 130048   ;;  %vm379_vm1 = vcmask 261120   ;;  %vm1689_vm4 = vcmask 64512   ;;  %s4379_s0 = inlined_call_operand.smem [shape: u32[42], index: -1, kind: input, shape index: {}] }
   0x1   :  { %s2970_s6 = sld [smem:[%s4379_s0 + %s3785_s3]]   ;;  %3712 = vset.pattern.permute.xlu1 %v3787_v0  ;;  %3711 = vset.pattern.permute.xlu0 %v3787_v0  ;;  %s3788_s14 = smov 6   ;;  %vm2955_vm5 = vcmask 326912  }
   0x2   :  { %s3839_s10 = sld [smem:[%s4379_s0 + %s3786_s7]]   ;;  %s3789_s18 = smov 1  }
   0x3   :  { %s3844_s13 = sld [smem:[%s4379_s0]]   ;;  %s3790_s22 = smov 4  }
   0x4   :  { %s2969_s17 = sld [smem:[%s4379_s0 + %s3788_s14]]   ;;  %s3791_s26 = smov 5  }
   0x5   :  { %s3852_s21 = sld [smem:[%s4379_s0 + %s3789_s18]]   ;;  %s3792_s30 = smov 11  }
   0x6   :  { %s3857_s25 = sld [smem:[%s4379_s0 + %s3790_s22]]   ;;  %s3793_s4 = smov 10  }
   0x7   :  { %v198_v1 = vld [vmem:[%s2970_s6] sm:$0xff]  ;;  %v199_v2 = vld [vmem:[%s2970_s6 + $0x8] sm:$0xff]  ;;  %s3865_s29 = sld [smem:[%s4379_s0 + %s3791_s26]]   ;;  %s3794_s8 = smov 8  }
   0x8   :  { %v182_v3 = vld [vmem:[%s3839_s10] sm:$0xff]  ;;  %v3492_v4 = vpack.c.bf16 %v199_v2, %v198_v1  ;;  %v183_v10 = vld [vmem:[%s3839_s10 + $0x8] sm:$0xff]  ;;  %v184_v11 = vld [vmem:[%s3839_s10 + $0x10] sm:$0xff]  ;;  %s2974_s3 = sld [smem:[%s4379_s0 + %s3792_s30]]   ;;  %s3795_s12 = smov 9  }
   0x9   :  { %3240 = vmatprep.mubr.msk.f32.mxu0 %vm281_vm0, %v182_v3  ;;  %v186_v14 = vld [vmem:[%s3844_s13] sm:$0xff]  ;;  %v185_v17 = vld [vmem:[%s3839_s10 + $0x18] sm:$0xff]  ;;  %v187_v20 = vld [vmem:[%s3844_s13 + $0x8] sm:$0xff]  ;;  %s3910_s7 = sld [smem:[%s4379_s0 + %s3793_s4]]   ;;  %s3822_s4 = smov 39  }
   0xa   :  { %v194_v5 = vld [vmem:[%s2969_s17] sm:$0xff]  ;;  %v195_v6 = vld [vmem:[%s2969_s17 + $0x8] sm:$0xff]  ;;  %v196_v7 = vld [vmem:[%s2969_s17 + $0x10] sm:$0xff]  ;;  %3493 = vmatprep.subr.bf16.mxu0 %v3492_v4  ;;  %s2971_s11 = sld [smem:[%s4379_s0 + %s3794_s8]]   ;;  %s3823_s8 = smov 37  }
   0xb   :  { %v3496_v8 = vpack.c.bf16 %v195_v6, %v194_v5  ;;  %v197_v9 = vld [vmem:[%s2969_s17 + $0x18] sm:$0xff]  ;;  %3495 = vmatpush3.bf16.msra.mxu0 %v3492_v4  ;;  %v178_v13 = vld [vmem:[%s3852_s21] sm:$0xff]  ;;  %v179_v19 = vld [vmem:[%s3852_s21 + $0x8] sm:$0xff]  ;;  %s2972_s16 = sld [smem:[%s4379_s0 + %s3795_s12]]   ;;  %s3796_s17 = smov 12  }
   0xc   :  { %v3500_v12 = vpack.c.bf16 %v197_v9, %v196_v7  ;;  %v172_v15 = vld [vmem:[%s3857_s25 + $0x10] sm:$0xff]  ;;  %v170_v16 = vld [vmem:[%s3857_s25] sm:$0xff]  ;;  %v3875_v18 = vadd.f32 %v186_v14, %v178_v13  ;;  %v173_v21 = vld [vmem:[%s3857_s25 + $0x18] sm:$0xff]  ;;  %v3884_v25 = vadd.f32 %v187_v20, %v179_v19  ;;  %v518_v20 = vlaneseq  ;;  %s3941_s20 = sld [smem:[%s4379_s0 + %s3796_s17]]   ;;  %s3824_s12 = smov 38  }
   0xd   :  { %3497 = vmatprep.subr.bf16.mxu0 %v3496_v8  ;;  %596 = vperm.xlu1 %3712, %v172_v15   ;;  %v180_v22 = vld [vmem:[%s3852_s21 + $0x10] sm:$0xff]  ;;  %v171_v24 = vld [vmem:[%s3857_s25 + $0x8] sm:$0xff]  ;;  %v181_v27 = vld [vmem:[%s3852_s21 + $0x18] sm:$0xff]  ;;  %s3797_s21 = smov 16   ;;  %s3798_s25 = smov 15  }
   0xe   :  { %3241 = vmatmul.mubr.msk.f32.vlgmr.msra.gmra.mrb[0].mxu0 %vm281_vm0, %v183_v10  ;;  %v188_v23 = vld [vmem:[%s3844_s13 + $0x10] sm:$0xff]  ;;  %586 = vperm.xlu0 %3711, %v170_v16   ;;  %v189_v28 = vld [vmem:[%s3844_s13 + $0x18] sm:$0xff]  ;;  %v175_v29 = vld [vmem:[%s3865_s29 + $0x8] sm:$0xff]  ;;  %s2979_s24 = sld [smem:[%s4379_s0 + %s3797_s21]]   ;;  %s3825_s17 = smov 41  }
   0xf   :  { %3499 = vmatpush3.bf16.msra.mxu0 %v3496_v8  ;;  %3243 = vmatprep.mubr.msk.f32.mxu0 %vm281_vm0, %v184_v11  ;;  %v3888_v26 = vadd.f32 %v188_v23, %v180_v22  ;;  %v174_v30 = vld [vmem:[%s3865_s29] sm:$0xff]  ;;  %v3896_v31 = vadd.f32 %v189_v28, %v181_v27  ;;  %v177_v32 = vld [vmem:[%s3865_s29 + $0x18] sm:$0xff]  ;;  %v176_v33 = vld [vmem:[%s3865_s29 + $0x10] sm:$0xff]  ;;  %s4010_s28 = sld [smem:[%s4379_s0 + %s3798_s25]]   ;;  %s3799_s29 = smov 13  }
  0x10   :  { %3501 = vmatprep.subr.bf16.mxu0 %v3500_v12  ;;  %v206_v34 = vld [vmem:[%s2974_s3] sm:$0xff]  ;;  %v207_v35 = vld [vmem:[%s2974_s3 + $0x8] sm:$0xff]  ;;  %v208_v37 = vld [vmem:[%s2974_s3 + $0x10] sm:$0xff]  ;;  %s2976_s2 = sld [smem:[%s4379_s0 + %s3799_s29]]   ;;  %s3827_s22 = smov 40  }
  0x11   :  { %601 = vperm.xlu1 %3712, %v173_v21   ;;  %v3504_v36 = vpack.c.bf16 %v207_v35, %v206_v34  ;;  %v209_v38 = vld [vmem:[%s2974_s3 + $0x18] sm:$0xff]  ;;  %v202_v40 = vld [vmem:[%s3910_s7] sm:$0xff]  ;;  %v203_v41 = vld [vmem:[%s3910_s7 + $0x8] sm:$0xff]  ;;  %v3931_v21 = vshrl.u32 %v518_v20, 7  ;;  %s3800_s3 = smov 14   ;;  %s4350_s21 = sld [smem:[%s4379_s0 + %s3825_s17]]  }
  0x12   :  { %3244 = vmatmul.mubr.msk.f32.gmra.mrb[2].mxu0 %vm281_vm0, %v185_v17  ;;  %591 = vperm.xlu0 %3711, %v171_v24   ;;  %v3508_v39 = vpack.c.bf16 %v209_v38, %v208_v37  ;;  %v3914_v42 = vpack.c.bf16 %v203_v41, %v202_v40  ;;  %v200_v22 = vld [vmem:[%s2971_s11] sm:$0x1]  ;;  %s2977_s6 = sld [smem:[%s4379_s0 + %s3800_s3]]   ;;  %s3802_s11 = smov 20  }
  0x13   :  { %3503 = vmatpush3.bf16.msra.mxu0 %v3500_v12  ;;  %3254 = vmatprep.mubr.msk.f32.mxu0 %vm379_vm1, %v3875_v18  ;;  %v3934_v23 = vsub.s32 0, %v3931_v21  ;;  %v201_v28 = vld [vmem:[%s2972_s16] sm:$0x1]  ;;  %vm579_vm2 = vcmp.lt.s32.totalorder %v3931_v21, 1  ;;  %vm612_vm3 = vcmp.lt.s32.totalorder %v3931_v21, 7  ;;  %s2983_s15 = sld [smem:[%s4379_s0 + %s3802_s11]]   ;;  %s3803_s16 = smov 22  }
  0x14   :  { %3505 = vmatprep.subr.bf16.mxu1 %v3504_v36  ;;  %s4087_s19 = sld [smem:[%s4379_s0 + %s3803_s16]]  }
  0x15   :  { %624 = vperm.xlu1 %3712, %v175_v29   ;;  %3507 = vmatpush3.bf16.msra.mxu1 %v3504_v36  ;;  %s3000_s11 = sld [smem:[%s4379_s0 + %s3823_s8]]  }
  0x16   :  { %3255 = vmatmul.mubr.msk.f32.vlgmr.msra.gmra.mrb[0].mxu0 %vm379_vm1, %v3884_v25  ;;  %619 = vperm.xlu0 %3711, %v174_v30   ;;  %s3001_s16 = sld [smem:[%s4379_s0 + %s3824_s12]]  }
  0x17   :  { %3257 = vmatprep.mubr.msk.f32.mxu0 %vm379_vm1, %v3888_v26  ;;  %3509 = vmatprep.subr.bf16.mxu1 %v3508_v39  ;;  %s3003_s25 = sld [smem:[%s4379_s0 + %s3827_s22]]  }
  0x19   :  { %634 = vperm.xlu1 %3712, %v177_v32   ;;  %3511 = vmatpush3.bf16.msra.mxu1 %v3508_v39 }
  0x1a   :  { %3258 = vmatmul.mubr.msk.f32.gmra.mrb[2].mxu0 %vm379_vm1, %v3896_v31  ;;  %629 = vperm.xlu0 %3711, %v176_v33  }
  0x1b   :  { %3513 = vmatprep.subr.bf16.mxu1 %v3914_v42 }
  0xe9   :  { %v3256_v43 = vpop.f32.mrb[0].mxu0 }
  0xea   :  { %v478_v44 = vsel %vm379_vm1, %v3256_v43, 0.0  ;;  %v492_v45 = vmul.f32 %v3256_v43, %v3256_v43  ;;  %v458_v46 = vpop.f32.mrb[1].mxu0 }
  0xeb   :  { %v477_v47 = vsel %vm379_vm1, %v458_v46, 0.0  ;;  %v491_v48 = vmul.f32 %v458_v46, %v458_v46 }
  0xec   :  { %v496_v49 = vsel %vm379_vm1, %v492_v45, 0.0  ;;  %v479_v50 = vadd.f32 %v478_v44, %v477_v47 }
  0xed   :  { %v495_v51 = vsel %vm379_vm1, %v491_v48, 0.0  ;;  %v3259_v52 = vpop.f32.mrb[2].mxu0 }
  0xee   :  { %v497_v53 = vadd.f32 %v496_v49, %v495_v51  ;;  %v468_v54 = vpop.f32.mrb[3].mxu0  ;;  %v494_v55 = vmul.f32 %v3259_v52, %v3259_v52  ;;  %v482_v59 = vsel %vm379_vm1, %v3259_v52, 0.0 }
  0xef   :  { %v480_v56 = vsel %vm379_vm1, %v468_v54, 0.0  ;;  %v493_v57 = vmul.f32 %v468_v54, %v468_v54 }
  0xf0   :  { %v481_v58 = vadd.f32 %v480_v56, %v479_v50  ;;  %v500_v63 = vsel %vm379_vm1, %v494_v55, 0.0 }
  0xf1   :  { %v498_v60 = vsel %vm379_vm1, %v493_v57, 0.0 }
  0xf2   :  { %v483_v61 = vadd.f32 %v482_v59, %v481_v58  ;;  %v499_v62 = vadd.f32 %v498_v60, %v497_v53 }
  0xf4   :  { %v484_v0 = vrot.slane %v483_v61, 4  ;;  %v501_v1 = vadd.f32 %v500_v63, %v499_v62 }
  0xf6   :  { %v485_v2 = vadd.f32 %v484_v0, %v483_v61  ;;  %v502_v3 = vrot.slane %v501_v1, 4 }
  0xf8   :  { %v486_v4 = vrot.slane %v485_v2, 2  ;;  %v503_v5 = vadd.f32 %v502_v3, %v501_v1 }
  0xfa   :  { %v487_v6 = vadd.f32 %v486_v4, %v485_v2  ;;  %v504_v7 = vrot.slane %v503_v5, 2 }
  0xfc   :  { %v488_v8 = vrot.slane %v487_v6, 1  ;;  %v505_v9 = vadd.f32 %v504_v7, %v503_v5 }
  0xfe   :  { %v489_v10 = vadd.f32 %v488_v8, %v487_v6  ;;  %v506_v11 = vrot.slane %v505_v9, 1 }
 0x100   :  { %v490_v12 = vmul.f32 0.03125, %v489_v10  ;;  %v507_v13 = vadd.f32 %v506_v11, %v505_v9  ;;  %v3944_v11 = vpop.permute.xlu0 %586 }
 0x102   :  { %v508_v14 = vmul.f32 0.03125, %v507_v13  ;;  %v509_v15 = vmul.f32 %v490_v12, %v490_v12 }
 0x104   :  { %v510_v16 = vsub.f32 %v508_v14, %v509_v15  ;;  %v204_v14 = vld [vmem:[%s3910_s7 + $0x10] sm:$0xff]  ;;  %v205_v15 = vld [vmem:[%s3910_s7 + $0x18] sm:$0xff]  ;;  %s3801_s7 = smov 17  }
 0x105   :  { %s4036_s10 = sld [smem:[%s4379_s0 + %s3801_s7]]  }
 0x106   :  { %v511_v17 = vmax.f32 %v510_v16, 0.0  ;;  %s3002_s7 = sld [smem:[%s4379_s0 + %s3822_s4]]  }
 0x108   :  { %v512_v19 = vadd.f32 1e-05, %v511_v17 }
 0x10a   :  { %3713 = vrsqrt.f32 %v512_v19 }
 0x114   :  { %v3714_v24 = vpop.eup %3713 }
 0x115   :  { %v514_v27 = vmul.f32 %v3714_v24, %v200_v22 }
 0x117   :  { %v515_v29 = vmul.f32 %v514_v27, %v490_v12  ;;  %v521_v30 = vrot.slane %v514_v27, %v3934_v23  ;;  %v3949_v27 = vpop.permute.xlu1 %596 }
 0x119   :  { %v516_v32 = vsub.f32 %v201_v28, %v515_v29  ;;  %v523_v33 = vmul.f32 %v521_v30, %v458_v46  ;;  %v524_v34 = vmul.f32 %v3256_v43, %v521_v30  ;;  %v525_v35 = vmul.f32 %v521_v30, %v468_v54 }
 0x11a   :  { %v526_v36 = vmul.f32 %v3259_v52, %v521_v30  ;;  %v3516_v30 = vpack.c.bf16 %v205_v15, %v204_v14 }
 0x11b   :  { %v531_v37 = vrot.slane %v516_v32, %v3934_v23 }
 0x11d   :  { %v534_v38 = vadd.f32 %v531_v37, %v524_v34  ;;  %v535_v39 = vadd.f32 %v531_v37, %v525_v35  ;;  %v536_v40 = vadd.f32 %v531_v37, %v526_v36  ;;  %v533_v41 = vadd.f32 %v531_v37, %v523_v33 }
 0x11f   :  { %v543_v44 = vmul.f32 0.044715, %v535_v39  ;;  %v542_v45 = vmul.f32 0.044715, %v534_v38  ;;  %v544_v47 = vmul.f32 0.044715, %v536_v40 }
 0x120   :  { %v541_v48 = vmul.f32 0.044715, %v533_v41  ;;  %v539_v1 = vmul.f32 0.5, %v535_v39  ;;  %v538_v4 = vmul.f32 0.5, %v534_v38  ;;  %v540_v8 = vmul.f32 0.5, %v536_v40 }
 0x121   :  { %v547_v49 = vmul.f32 %v543_v44, %v535_v39  ;;  %v546_v50 = vmul.f32 %v542_v45, %v534_v38  ;;  %v548_v51 = vmul.f32 %v544_v47, %v536_v40  ;;  %v537_v12 = vmul.f32 0.5, %v533_v41 }
 0x122   :  { %v545_v53 = vmul.f32 %v541_v48, %v533_v41 }
 0x123   :  { %v551_v55 = vmul.f32 %v547_v49, %v535_v39  ;;  %v550_v56 = vmul.f32 %v546_v50, %v534_v38  ;;  %v552_v46 = vmul.f32 %v548_v51, %v536_v40  ;;  %v3976_v50 = vpop.permute.xlu1 %601  ;;  %v212_v51 = vld [vmem:[%s3941_s20 + $0x10] sm:$0xff] }
 0x124   :  { %v549_v43 = vmul.f32 %v545_v53, %v533_v41  ;;  %v213_v53 = vld [vmem:[%s3941_s20 + $0x18] sm:$0xff] }
 0x125   :  { %v555_v54 = vadd.f32 %v551_v55, %v535_v39  ;;  %v554_v52 = vadd.f32 %v550_v56, %v534_v38  ;;  %v556_v57 = vadd.f32 %v552_v46, %v536_v40  ;;  %v210_v38 = vld [vmem:[%s3941_s20] sm:$0xff]  ;;  %v211_v39 = vld [vmem:[%s3941_s20 + $0x8] sm:$0xff]  ;;  %v3963_v40 = vpop.permute.xlu0 %591  ;;  %v3524_v56 = vpack.c.bf16 %v213_v53, %v212_v51  ;;  %s3804_s20 = smov 18  }
 0x126   :  { %v553_v58 = vadd.f32 %v549_v43, %v533_v41  ;;  %v3520_v49 = vpack.c.bf16 %v211_v39, %v210_v38  ;;  %s2981_s23 = sld [smem:[%s4379_s0 + %s3804_s20]]   ;;  %s3812_s20 = smov 25  }
 0x127   :  { %v559_v59 = vmul.f32 0.7978846, %v555_v54  ;;  %v558_v60 = vmul.f32 0.7978846, %v554_v52  ;;  %v560_v61 = vmul.f32 0.7978846, %v556_v57  ;;  %v3987_v43 = vpop.permute.xlu1 %624 }
 0x128   :  { %v557_v62 = vmul.f32 0.7978846, %v553_v58 }
 0x129   :  { %3715 = vtanh.f32 %v559_v59 }
 0x12a   :  { %3717 = vtanh.f32 %v558_v60 }
 0x12b   :  { %3719 = vtanh.f32 %v560_v61  ;;  %v3997_v59 = vpop.permute.xlu1 %634 }
 0x12c   :  { %3721 = vtanh.f32 %v557_v62  ;;  %v220_v62 = vld [vmem:[%s2979_s24] sm:$0xff] }
 0x133   :  { %v3716_v63 = vpop.eup %3715 }
 0x134   :  { %v3718_v0 = vpop.eup %3717  ;;  %v567_v2 = vadd.f32 1.0, %v3716_v63  ;;  %v221_v63 = vld [vmem:[%s2979_s24 + $0x8] sm:$0xff] }
 0x135   :  { %v3720_v3 = vpop.eup %3719  ;;  %v566_v5 = vadd.f32 1.0, %v3718_v0  ;;  %v222_v0 = vld [vmem:[%s2979_s24 + $0x10] sm:$0xff] }
 0x136   :  { %v3722_v6 = vpop.eup %3721  ;;  %v571_v7 = vmul.f32 %v567_v2, %v539_v1  ;;  %v568_v9 = vadd.f32 1.0, %v3720_v3  ;;  %v3528_v1 = vpack.c.bf16 %v221_v63, %v220_v62  ;;  %v223_v2 = vld [vmem:[%s2979_s24 + $0x18] sm:$0xff]  ;;  %s3805_s24 = smov 19  }
 0x137   :  { %v570_v10 = vmul.f32 %v566_v5, %v538_v4  ;;  %v565_v13 = vadd.f32 1.0, %v3722_v6  ;;  %v3532_v3 = vpack.c.bf16 %v223_v2, %v222_v0  ;;  %v216_v4 = vld [vmem:[%s4010_s28] sm:$0xff]  ;;  %v217_v5 = vld [vmem:[%s4010_s28 + $0x8] sm:$0xff]  ;;  %s2982_s27 = sld [smem:[%s4379_s0 + %s3805_s24]]   ;;  %s3813_s24 = smov 30  }
 0x138   :  { %v575_v16 = vrot.slane %v571_v7, 7  ;;  %v572_v17 = vmul.f32 %v568_v9, %v540_v8  ;;  %v610_v19 = vrot.slane %v571_v7, 1  ;;  %3529 = vmatprep.subr.bf16.mxu0 %v3528_v1  ;;  %v4014_v6 = vpack.c.bf16 %v217_v5, %v216_v4  ;;  %v215_v0 = vld [vmem:[%s2977_s6] sm:$0x1]  ;;  %s3808_s6 = smov 21  }
 0x139   :  { %v574_v20 = vrot.slane %v570_v10, 7  ;;  %v609_v22 = vrot.slane %v570_v10, 1  ;;  %v569_v24 = vmul.f32 %v565_v13, %v537_v12  ;;  %3531 = vmatpush3.bf16.msra.mxu0 %v3528_v1  ;;  %s2984_s9 = sld [smem:[%s4379_s0 + %s3808_s6]]   ;;  %s3816_s6 = smov 28  }
 0x13a   :  { %v576_v28 = vrot.slane %v572_v17, 7  ;;  %v611_v29 = vrot.slane %v572_v17, 1  ;;  %3533 = vmatprep.subr.bf16.mxu0 %v3532_v3 }
 0x13b   :  { %v581_v32 = vsel %vm579_vm2, %v574_v20, %v575_v16  ;;  %v614_v33 = vsel %vm612_vm3, %v609_v22, %v610_v19  ;;  %v573_v34 = vrot.slane %v569_v24, 7  ;;  %v608_v35 = vrot.slane %v569_v24, 1  ;;  %3268 = vmatprep.mubr.msk.f32.mxu1 %vm379_vm1, %v569_v24 }
 0x13c   :  { %v580_v36 = vsel %vm579_vm2, %v575_v16, %v576_v28  ;;  %3269 = vmatmul.mubr.msk.f32.vlgmr.msra.gmra.mrb[0].mxu1 %vm379_vm1, %v570_v10  ;;  %v613_v37 = vsel %vm612_vm3, %v610_v19, %v611_v29  ;;  %v606_v46 = vmul.f32 %v3949_v27, %v581_v32  ;;  %v638_v58 = vmul.f32 %v3987_v43, %v614_v33 }
 0x13d   :  { %v582_v41 = vsel %vm579_vm2, %v573_v34, %v574_v20  ;;  %v616_v44 = vsel %vm612_vm3, %v611_v29, %v608_v35  ;;  %3271 = vmatprep.mubr.msk.f32.mxu1 %vm379_vm1, %v571_v7  ;;  %3515 = vmatpush3.bf16.msra.mxu1 %v3914_v42  ;;  %v583_v45 = vsel %vm579_vm2, %v576_v28, %v573_v34  ;;  %v3982_v42 = vpop.permute.xlu0 %619 }
 0x13e   :  { %v615_v47 = vsel %vm612_vm3, %v608_v35, %v609_v22  ;;  %3517 = vmatprep.subr.bf16.mxu1 %v3516_v30  ;;  %v604_v48 = vmul.f32 %v3944_v11, %v583_v45  ;;  %v605_v55 = vmul.f32 %v3963_v40, %v582_v41  ;;  %v607_v54 = vmul.f32 %v3976_v50, %v580_v36 }
 0x13f   :  { %v637_v52 = vmul.f32 %v3982_v42, %v615_v47  ;;  %v640_v61 = vmul.f32 %v3997_v59, %v616_v44  ;;  %3535 = vmatpush3.bf16.msra.mxu0 %v3532_v3 }
 0x140   :  { %3272 = vmatmul.mubr.msk.f32.gmra.mrb[2].mxu1 %vm379_vm1, %v572_v17  ;;  %3537 = vmatprep.subr.bf16.mxu0 %v4014_v6 }
 0x141   :  { %3282 = vmatprep.mubr.msk.f32.mxu1 %vm379_vm1, %v604_v48  ;;  %3519 = vmatpush3.bf16.msra.mxu1 %v3516_v30  ;;  %v3992_v57 = vpop.permute.xlu0 %629 }
 0x142   :  { %3521 = vmatprep.subr.bf16.mxu1 %v3520_v49  ;;  %v639_v60 = vmul.f32 %v3992_v57, %v613_v37 }
 0x144   :  { %3283 = vmatmul.mubr.msk.f32.vlgmr.msra.gmra.mrb[0].mxu1 %vm379_vm1, %v605_v55 }
 0x145   :  { %3285 = vmatprep.mubr.msk.f32.mxu1 %vm379_vm1, %v606_v46  ;;  %3523 = vmatpush3.bf16.msra.mxu1 %v3520_v49 }
 0x146   :  { %3525 = vmatprep.subr.bf16.mxu1 %v3524_v56 }
 0x148   :  { %3286 = vmatmul.mubr.msk.f32.gmra.mrb[2].mxu1 %vm379_vm1, %v607_v54 }
 0x149   :  { %3527 = vmatpush3.bf16.msra.mxu1 %v3524_v56  ;;  %3296 = vmatprep.mubr.msk.f32.mxu1 %vm379_vm1, %v637_v52 }
 0x14c   :  { %3297 = vmatmul.mubr.msk.f32.vlgmr.msra.gmra.mrb[0].mxu1 %vm379_vm1, %v638_v58 }
 0x14d   :  { %3299 = vmatprep.mubr.msk.f32.mxu1 %vm379_vm1, %v639_v60 }
 0x150   :  { %3300 = vmatmul.mubr.msk.f32.gmra.mrb[2].mxu1 %vm379_vm1, %v640_v61  ;;  %v214_v61 = vld [vmem:[%s2976_s2] sm:$0x1]  ;;  %s3807_s2 = smov 23  }
 0x151   :  { %s2986_s5 = sld [smem:[%s4379_s0 + %s3807_s2]]   ;;  %s3815_s2 = smov 27  }
 0x21f   :  { %v3298_v7 = vpop.f32.mrb[0].mxu1 }
 0x220   :  { %v937_v8 = vsel %vm379_vm1, %v3298_v7, 0.0  ;;  %v951_v9 = vmul.f32 %v3298_v7, %v3298_v7  ;;  %v913_v10 = vpop.f32.mrb[1].mxu1 }
 0x221   :  { %v936_v12 = vsel %vm379_vm1, %v913_v10, 0.0  ;;  %v950_v13 = vmul.f32 %v913_v10, %v913_v10 }
 0x222   :  { %v955_v14 = vsel %vm379_vm1, %v951_v9, 0.0  ;;  %v938_v15 = vadd.f32 %v937_v8, %v936_v12 }
 0x223   :  { %v954_v16 = vsel %vm379_vm1, %v950_v13, 0.0  ;;  %v3301_v17 = vpop.f32.mrb[2].mxu1 }
 0x224   :  { %v956_v19 = vadd.f32 %v955_v14, %v954_v16  ;;  %v923_v20 = vpop.f32.mrb[3].mxu1  ;;  %v953_v22 = vmul.f32 %v3301_v17, %v3301_v17  ;;  %v941_v30 = vsel %vm379_vm1, %v3301_v17, 0.0 }
 0x225   :  { %v939_v24 = vsel %vm379_vm1, %v923_v20, 0.0  ;;  %v952_v28 = vmul.f32 %v923_v20, %v923_v20 }
 0x226   :  { %v940_v29 = vadd.f32 %v939_v24, %v938_v15  ;;  %v959_v35 = vsel %vm379_vm1, %v953_v22, 0.0 }
 0x227   :  { %v957_v32 = vsel %vm379_vm1, %v952_v28, 0.0 }
 0x228   :  { %v942_v33 = vadd.f32 %v941_v30, %v940_v29  ;;  %v958_v34 = vadd.f32 %v957_v32, %v956_v19 }
 0x22a   :  { %v943_v36 = vrot.slane %v942_v33, 4  ;;  %v960_v37 = vadd.f32 %v959_v35, %v958_v34 }
 0x22c   :  { %v944_v38 = vadd.f32 %v943_v36, %v942_v33  ;;  %v961_v39 = vrot.slane %v960_v37, 4 }
 0x22e   :  { %v945_v41 = vrot.slane %v944_v38, 2  ;;  %v962_v44 = vadd.f32 %v961_v39, %v960_v37 }
 0x230   :  { %v946_v45 = vadd.f32 %v945_v41, %v944_v38  ;;  %v963_v47 = vrot.slane %v962_v44, 2 }
 0x232   :  { %v947_v48 = vrot.slane %v946_v45, 1  ;;  %v964_v49 = vadd.f32 %v963_v47, %v962_v44 }
 0x234   :  { %v948_v51 = vadd.f32 %v947_v48, %v946_v45  ;;  %v965_v53 = vrot.slane %v964_v49, 1 }
 0x236   :  { %v949_v55 = vmul.f32 0.03125, %v948_v51  ;;  %v966_v56 = vadd.f32 %v965_v53, %v964_v49 }
 0x238   :  { %v967_v46 = vmul.f32 0.03125, %v966_v56  ;;  %v968_v54 = vmul.f32 %v949_v55, %v949_v55  ;;  %v218_v56 = vld [vmem:[%s4010_s28 + $0x10] sm:$0xff] }
 0x23a   :  { %v969_v52 = vsub.f32 %v967_v46, %v968_v54  ;;  %v219_v46 = vld [vmem:[%s4010_s28 + $0x18] sm:$0xff]  ;;  %s3806_s28 = smov 24  }
 0x23b   :  { %s2987_s1 = sld [smem:[%s4379_s0 + %s3806_s28]]   ;;  %s3814_s28 = smov 29  }
 0x23c   :  { %v970_v58 = vmax.f32 %v969_v52, 0.0 }
 0x23e   :  { %v971_v60 = vadd.f32 1e-05, %v970_v58 }
 0x240   :  { %3723 = vrsqrt.f32 %v971_v60 }
 0x24a   :  { %v3724_v62 = vpop.eup %3723 }
 0x24b   :  { %v973_v63 = vmul.f32 %v3724_v62, %v214_v61 }
 0x24d   :  { %v974_v1 = vmul.f32 %v973_v63, %v949_v55  ;;  %v980_v2 = vrot.slane %v973_v63, %v3934_v23 }
 0x24f   :  { %v975_v3 = vsub.f32 %v215_v0, %v974_v1  ;;  %v982_v4 = vmul.f32 %v980_v2, %v913_v10  ;;  %v983_v5 = vmul.f32 %v3298_v7, %v980_v2  ;;  %v984_v8 = vmul.f32 %v980_v2, %v923_v20 }
 0x250   :  { %v985_v9 = vmul.f32 %v3301_v17, %v980_v2  ;;  %v3540_v2 = vpack.c.bf16 %v219_v46, %v218_v56 }
 0x251   :  { %v990_v12 = vrot.slane %v975_v3, %v3934_v23 }
 0x253   :  { %v992_v13 = vadd.f32 %v990_v12, %v982_v4  ;;  %v993_v14 = vadd.f32 %v990_v12, %v983_v5  ;;  %v994_v15 = vadd.f32 %v990_v12, %v984_v8  ;;  %v995_v16 = vadd.f32 %v990_v12, %v985_v9  ;;  %v224_v9 = vld [vmem:[%s4036_s10] sm:$0xff]  ;;  %v225_v12 = vld [vmem:[%s4036_s10 + $0x8] sm:$0xff] }
 0x255   :  { %v1001_v19 = vmul.f32 0.044715, %v993_v14  ;;  %v1002_v22 = vmul.f32 0.044715, %v994_v15  ;;  %v1000_v24 = vmul.f32 0.044715, %v992_v13 }
 0x256   :  { %v1003_v28 = vmul.f32 0.044715, %v995_v16  ;;  %v997_v48 = vmul.f32 0.5, %v993_v14  ;;  %v996_v53 = vmul.f32 0.5, %v992_v13  ;;  %v998_v58 = vmul.f32 0.5, %v994_v15 }
 0x257   :  { %v1005_v29 = vmul.f32 %v1001_v19, %v993_v14  ;;  %v1006_v30 = vmul.f32 %v1002_v22, %v994_v15  ;;  %v1004_v32 = vmul.f32 %v1000_v24, %v992_v13  ;;  %v999_v62 = vmul.f32 0.5, %v995_v16 }
 0x258   :  { %v1007_v33 = vmul.f32 %v1003_v28, %v995_v16  ;;  %v3544_v24 = vpack.c.bf16 %v225_v12, %v224_v9 }
 0x259   :  { %v1009_v34 = vmul.f32 %v1005_v29, %v993_v14  ;;  %v1010_v35 = vmul.f32 %v1006_v30, %v994_v15  ;;  %v1008_v10 = vmul.f32 %v1004_v32, %v992_v13 }
 0x25a   :  { %v1011_v7 = vmul.f32 %v1007_v33, %v995_v16  ;;  %v227_v33 = vld [vmem:[%s4036_s10 + $0x18] sm:$0xff] }
 0x25b   :  { %v1013_v20 = vadd.f32 %v1009_v34, %v993_v14  ;;  %v1014_v17 = vadd.f32 %v1010_v35, %v994_v15  ;;  %v1012_v36 = vadd.f32 %v1008_v10, %v992_v13 }
 0x25c   :  { %v1015_v37 = vadd.f32 %v1011_v7, %v995_v16 }
 0x25d   :  { %v1017_v38 = vmul.f32 0.7978846, %v1013_v20  ;;  %v1018_v39 = vmul.f32 0.7978846, %v1014_v17  ;;  %v1016_v41 = vmul.f32 0.7978846, %v1012_v36 }
 0x25e   :  { %v1019_v44 = vmul.f32 0.7978846, %v1015_v37 }
 0x25f   :  { %3725 = vtanh.f32 %v1017_v38 }
 0x260   :  { %3727 = vtanh.f32 %v1016_v41 }
 0x261   :  { %3729 = vtanh.f32 %v1018_v39 }
 0x262   :  { %3731 = vtanh.f32 %v1019_v44  ;;  %v230_v44 = vld [vmem:[%s2983_s15] sm:$0xff] }
 0x269   :  { %v3726_v45 = vpop.eup %3725 }
 0x26a   :  { %v3728_v47 = vpop.eup %3727  ;;  %v1025_v49 = vadd.f32 1.0, %v3726_v45  ;;  %v231_v45 = vld [vmem:[%s2983_s15 + $0x8] sm:$0xff] }
 0x26b   :  { %v3730_v51 = vpop.eup %3729  ;;  %v1024_v55 = vadd.f32 1.0, %v3728_v47  ;;  %v232_v47 = vld [vmem:[%s2983_s15 + $0x10] sm:$0xff] }
 0x26c   :  { %v3732_v54 = vpop.eup %3731  ;;  %v1029_v52 = vmul.f32 %v1025_v49, %v997_v48  ;;  %v1026_v60 = vadd.f32 1.0, %v3730_v51  ;;  %v3552_v48 = vpack.c.bf16 %v231_v45, %v230_v44  ;;  %v233_v49 = vld [vmem:[%s2983_s15 + $0x18] sm:$0xff]  ;;  %s3810_s15 = smov 26  }
 0x26d   :  { %v1028_v61 = vmul.f32 %v1024_v55, %v996_v53  ;;  %v1027_v63 = vadd.f32 1.0, %v3732_v54  ;;  %v3556_v51 = vpack.c.bf16 %v233_v49, %v232_v47  ;;  %v235_v53 = vld [vmem:[%s4087_s19] sm:$0xff]  ;;  %v236_v55 = vld [vmem:[%s4087_s19 + $0x8] sm:$0xff]  ;;  %s4142_s18 = sld [smem:[%s4379_s0 + %s3810_s15]]   ;;  %s3818_s15 = smov 35  }
 0x26e   :  { %v1033_v0 = vrot.slane %v1029_v52, 7  ;;  %v1030_v1 = vmul.f32 %v1026_v60, %v998_v58  ;;  %v1045_v3 = vrot.slane %v1029_v52, 1  ;;  %3553 = vmatprep.subr.bf16.mxu1 %v3552_v48  ;;  %v4091_v56 = vpack.c.bf16 %v236_v55, %v235_v53  ;;  %v229_v47 = vld [vmem:[%s2982_s27] sm:$0x1]  ;;  %s2993_s27 = sld [smem:[%s4379_s0 + %s3813_s24]]  }
 0x26f   :  { %v1032_v4 = vrot.slane %v1028_v61, 7  ;;  %v1044_v5 = vrot.slane %v1028_v61, 1  ;;  %3310 = vmatprep.mubr.msk.f32.mxu0 %vm379_vm1, %v1028_v61  ;;  %v1031_v8 = vmul.f32 %v1027_v63, %v999_v62  ;;  %3555 = vmatpush3.bf16.msra.mxu1 %v3552_v48 }
 0x270   :  { %3311 = vmatmul.mubr.msk.f32.vlgmr.msra.gmra.mrb[4].mxu0 %vm379_vm1, %v1029_v52  ;;  %v1034_v13 = vrot.slane %v1030_v1, 7  ;;  %v1046_v14 = vrot.slane %v1030_v1, 1  ;;  %3557 = vmatprep.subr.bf16.mxu1 %v3556_v51 }
 0x271   :  { %v1038_v15 = vsel %vm579_vm2, %v1032_v4, %v1033_v0  ;;  %3313 = vmatprep.mubr.msk.f32.mxu0 %vm379_vm1, %v1030_v1  ;;  %3539 = vmatpush3.bf16.msra.mxu0 %v4014_v6  ;;  %v1035_v16 = vrot.slane %v1031_v8, 7  ;;  %v1047_v19 = vrot.slane %v1031_v8, 1  ;;  %v1050_v22 = vsel %vm612_vm3, %v1044_v5, %v1045_v3  ;;  %v226_v6 = vld [vmem:[%s4036_s10 + $0x10] sm:$0xff]  ;;  %s3809_s10 = smov 3  }
 0x272   :  { %3541 = vmatprep.subr.bf16.mxu0 %v3540_v2  ;;  %v1037_v28 = vsel %vm579_vm2, %v1033_v0, %v1034_v13  ;;  %v1049_v29 = vsel %vm612_vm3, %v1045_v3, %v1046_v14  ;;  %v1041_v7 = vmul.f32 %v1038_v15, %v3963_v40  ;;  %v3548_v20 = vpack.c.bf16 %v227_v33, %v226_v6  ;;  %s2966_s14 = sld [smem:[%s4379_s0 + %s3809_s10]]   ;;  %s3817_s10 = smov 31  }
 0x273   :  { %v1039_v30 = vsel %vm579_vm2, %v1035_v16, %v1032_v4  ;;  %v1036_v32 = vsel %vm579_vm2, %v1034_v13, %v1035_v16  ;;  %v1048_v35 = vsel %vm612_vm3, %v1046_v14, %v1047_v19  ;;  %v1051_v10 = vsel %vm612_vm3, %v1047_v19, %v1044_v5  ;;  %3559 = vmatpush3.bf16.msra.mxu1 %v3556_v51 }
 0x274   :  { %3314 = vmatmul.mubr.msk.f32.gmra.mrb[6].mxu0 %vm379_vm1, %v1031_v8  ;;  %v1040_v34 = vmul.f32 %v1039_v30, %v3944_v11  ;;  %v1042_v17 = vmul.f32 %v1037_v28, %v3949_v27  ;;  %v1043_v36 = vmul.f32 %v1036_v32, %v3976_v50  ;;  %v1052_v37 = vmul.f32 %v1050_v22, %v3982_v42 }
 0x275   :  { %3543 = vmatpush3.bf16.msra.mxu0 %v3540_v2  ;;  %v1053_v38 = vmul.f32 %v1049_v29, %v3987_v43  ;;  %v1054_v39 = vmul.f32 %v1048_v35, %v3992_v57  ;;  %v1055_v41 = vmul.f32 %v1051_v10, %v3997_v59  ;;  %3561 = vmatprep.subr.bf16.mxu1 %v4091_v56 }
 0x276   :  { %3324 = vmatprep.mubr.msk.f32.mxu0 %vm379_vm1, %v1040_v34  ;;  %3545 = vmatprep.subr.bf16.mxu0 %v3544_v24 }
 0x278   :  { %3325 = vmatmul.mubr.msk.f32.vlgmr.msra.gmra.mrb[4].mxu0 %vm379_vm1, %v1041_v7 }
 0x279   :  { %3327 = vmatprep.mubr.msk.f32.mxu0 %vm379_vm1, %v1042_v17  ;;  %3547 = vmatpush3.bf16.msra.mxu0 %v3544_v24 }
 0x27a   :  { %3549 = vmatprep.subr.bf16.mxu0 %v3548_v20 }
 0x27c   :  { %3328 = vmatmul.mubr.msk.f32.gmra.mrb[6].mxu0 %vm379_vm1, %v1043_v36 }
 0x27d   :  { %3551 = vmatpush3.bf16.msra.mxu0 %v3548_v20  ;;  %3338 = vmatprep.mubr.msk.f32.mxu0 %vm379_vm1, %v1052_v37 }
 0x280   :  { %3339 = vmatmul.mubr.msk.f32.vlgmr.msra.gmra.mrb[4].mxu0 %vm379_vm1, %v1053_v38 }
 0x281   :  { %3341 = vmatprep.mubr.msk.f32.mxu0 %vm379_vm1, %v1054_v39 }
 0x284   :  { %3342 = vmatmul.mubr.msk.f32.gmra.mrb[6].mxu0 %vm379_vm1, %v1055_v41  ;;  %v228_v41 = vld [vmem:[%s2981_s23] sm:$0x1]  ;;  %s2988_s23 = sld [smem:[%s4379_s0 + %s3812_s20]]   ;;  %s3819_s20 = smov 34  }
 0x353   :  { %v3340_v46 = vpop.f32.mrb[4].mxu0 }
 0x354   :  { %v1352_v54 = vsel %vm379_vm1, %v3340_v46, 0.0  ;;  %v1366_v52 = vmul.f32 %v3340_v46, %v3340_v46  ;;  %v1328_v58 = vpop.f32.mrb[5].mxu0 }
 0x355   :  { %v1351_v60 = vsel %vm379_vm1, %v1328_v58, 0.0  ;;  %v1365_v61 = vmul.f32 %v1328_v58, %v1328_v58 }
 0x356   :  { %v1370_v62 = vsel %vm379_vm1, %v1366_v52, 0.0  ;;  %v1353_v63 = vadd.f32 %v1352_v54, %v1351_v60 }
 0x357   :  { %v1369_v0 = vsel %vm379_vm1, %v1365_v61, 0.0  ;;  %v3343_v1 = vpop.f32.mrb[6].mxu0 }
 0x358   :  { %v1371_v2 = vadd.f32 %v1370_v62, %v1369_v0  ;;  %v1338_v3 = vpop.f32.mrb[7].mxu0  ;;  %v1368_v4 = vmul.f32 %v3343_v1, %v3343_v1  ;;  %v1356_v12 = vsel %vm379_vm1, %v3343_v1, 0.0 }
 0x359   :  { %v1354_v5 = vsel %vm379_vm1, %v1338_v3, 0.0  ;;  %v1367_v8 = vmul.f32 %v1338_v3, %v1338_v3 }
 0x35a   :  { %v1355_v9 = vadd.f32 %v1354_v5, %v1353_v63  ;;  %v1374_v16 = vsel %vm379_vm1, %v1368_v4, 0.0 }
 0x35b   :  { %v1372_v13 = vsel %vm379_vm1, %v1367_v8, 0.0 }
 0x35c   :  { %v1357_v14 = vadd.f32 %v1356_v12, %v1355_v9  ;;  %v1373_v15 = vadd.f32 %v1372_v13, %v1371_v2 }
 0x35e   :  { %v1358_v19 = vrot.slane %v1357_v14, 4  ;;  %v1375_v22 = vadd.f32 %v1374_v16, %v1373_v15 }
 0x360   :  { %v1359_v24 = vadd.f32 %v1358_v19, %v1357_v14  ;;  %v1376_v28 = vrot.slane %v1375_v22, 4 }
 0x362   :  { %v1360_v29 = vrot.slane %v1359_v24, 2  ;;  %v1377_v30 = vadd.f32 %v1376_v28, %v1375_v22 }
 0x364   :  { %v1361_v32 = vadd.f32 %v1360_v29, %v1359_v24  ;;  %v1378_v6 = vrot.slane %v1377_v30, 2 }
 0x366   :  { %v1362_v33 = vrot.slane %v1361_v32, 1  ;;  %v1379_v34 = vadd.f32 %v1378_v6, %v1377_v30 }
 0x368   :  { %v1363_v35 = vadd.f32 %v1362_v33, %v1361_v32  ;;  %v1380_v10 = vrot.slane %v1379_v34, 1 }
 0x36a   :  { %v1364_v7 = vmul.f32 0.03125, %v1363_v35  ;;  %v1381_v20 = vadd.f32 %v1380_v10, %v1379_v34  ;;  %v237_v35 = vld [vmem:[%s4087_s19 + $0x10] sm:$0xff]  ;;  %v238_v10 = vld [vmem:[%s4087_s19 + $0x18] sm:$0xff]  ;;  %s3811_s19 = smov 32  }
 0x36b   :  { %s2995_s26 = sld [smem:[%s4379_s0 + %s3811_s19]]  }
 0x36c   :  { %v1382_v17 = vmul.f32 0.03125, %v1381_v20  ;;  %v1383_v36 = vmul.f32 %v1364_v7, %v1364_v7 }
 0x36e   :  { %v1384_v37 = vsub.f32 %v1382_v17, %v1383_v36 }
 0x370   :  { %v1385_v38 = vmax.f32 %v1384_v37, 0.0 }
 0x372   :  { %v1386_v39 = vadd.f32 1e-05, %v1385_v38 }
 0x374   :  { %3733 = vrsqrt.f32 %v1386_v39 }
 0x37e   :  { %v3734_v44 = vpop.eup %3733 }
 0x37f   :  { %v1388_v45 = vmul.f32 %v3734_v44, %v228_v41 }
 0x381   :  { %v1389_v48 = vmul.f32 %v1388_v45, %v1364_v7  ;;  %v1395_v49 = vrot.slane %v1388_v45, %v3934_v23  ;;  %v3564_v45 = vpack.c.bf16 %v238_v10, %v237_v35  ;;  %v1679_v35 = vld [vmem:[%s2966_s14 + $0x10] sm:$0xff] }
 0x383   :  { %v1390_v51 = vsub.f32 %v229_v47, %v1389_v48  ;;  %v1397_v53 = vmul.f32 %v1395_v49, %v1328_v58  ;;  %v1398_v55 = vmul.f32 %v3340_v46, %v1395_v49  ;;  %v1399_v54 = vmul.f32 %v1395_v49, %v1338_v3 }
 0x384   :  { %v1400_v52 = vmul.f32 %v3343_v1, %v1395_v49 }
 0x385   :  { %v1405_v60 = vrot.slane %v1390_v51, %v3934_v23  ;;  %v240_v51 = vld [vmem:[%s2987_s1] sm:$0xff]  ;;  %s4175_s1 = sld [smem:[%s4379_s0 + %s3814_s28]]  }
 0x386   :  { %3372 = vmatprep.subr.mxu0 %v240_v51 }
 0x387   :  { %v1407_v61 = vadd.f32 %v1405_v60, %v1397_v53  ;;  %v1408_v62 = vadd.f32 %v1405_v60, %v1398_v55  ;;  %v1409_v63 = vadd.f32 %v1405_v60, %v1399_v54  ;;  %v1410_v0 = vadd.f32 %v1405_v60, %v1400_v52  ;;  %3373 = vmatpush3.msra.mxu0 %v240_v51  ;;  %v3042_v52 = vld [vmem:[%s2986_s5] ss:$0 sm:$0xff]  ;;  %s2990_s5 = sld [smem:[%s4379_s0 + %s3815_s2]]  }
 0x389   :  { %v1417_v2 = vmul.f32 0.044715, %v1409_v63  ;;  %v1415_v4 = vmul.f32 0.044715, %v1407_v61  ;;  %v1416_v5 = vmul.f32 0.044715, %v1408_v62 }
 0x38a   :  { %v1418_v8 = vmul.f32 0.044715, %v1410_v0  ;;  %v1411_v33 = vmul.f32 0.5, %v1407_v61  ;;  %v1412_v20 = vmul.f32 0.5, %v1408_v62  ;;  %v1413_v38 = vmul.f32 0.5, %v1409_v63 }
 0x38b   :  { %v1419_v9 = vmul.f32 %v1415_v4, %v1407_v61  ;;  %v1421_v12 = vmul.f32 %v1417_v2, %v1409_v63  ;;  %v1420_v13 = vmul.f32 %v1416_v5, %v1408_v62  ;;  %v1414_v48 = vmul.f32 0.5, %v1410_v0 }
 0x38c   :  { %v1422_v14 = vmul.f32 %v1418_v8, %v1410_v0 }
 0x38d   :  { %v1423_v15 = vmul.f32 %v1419_v9, %v1407_v61  ;;  %v1425_v16 = vmul.f32 %v1421_v12, %v1409_v63  ;;  %v1424_v58 = vmul.f32 %v1420_v13, %v1408_v62 }
 0x38e   :  { %v1426_v46 = vmul.f32 %v1422_v14, %v1410_v0  ;;  %v3037_v14 = vld [vmem:[%s2984_s9] ss:$0 sm:$0xff]  ;;  %s2991_s9 = sld [smem:[%s4379_s0 + %s3816_s6]]  }
 0x38f   :  { %v1427_v3 = vadd.f32 %v1423_v15, %v1407_v61  ;;  %v1429_v1 = vadd.f32 %v1425_v16, %v1409_v63  ;;  %v1428_v19 = vadd.f32 %v1424_v58, %v1408_v62  ;;  %v1678_v58 = vld [vmem:[%s2966_s14 + $0x8] sm:$0xff] }
 0x390   :  { %v1430_v22 = vadd.f32 %v1426_v46, %v1410_v0  ;;  %v1677_v46 = vld [vmem:[%s2966_s14] sm:$0xff] }
 0x391   :  { %v1431_v24 = vmul.f32 0.7978846, %v1427_v3  ;;  %v1433_v28 = vmul.f32 0.7978846, %v1429_v1  ;;  %v1432_v29 = vmul.f32 0.7978846, %v1428_v19 }
 0x392   :  { %v1434_v30 = vmul.f32 0.7978846, %v1430_v22 }
 0x393   :  { %3735 = vtanh.f32 %v1431_v24 }
 0x394   :  { %3737 = vtanh.f32 %v1432_v29 }
 0x395   :  { %3739 = vtanh.f32 %v1433_v28 }
 0x396   :  { %3741 = vtanh.f32 %v1434_v30 }
 0x39d   :  { %v3736_v32 = vpop.eup %3735 }
 0x39e   :  { %v3738_v6 = vpop.eup %3737  ;;  %v1439_v34 = vadd.f32 1.0, %v3736_v32 }
 0x39f   :  { %v3740_v7 = vpop.eup %3739  ;;  %v1440_v17 = vadd.f32 1.0, %v3738_v6  ;;  %v1680_v6 = vld [vmem:[%s2966_s14 + $0x18] sm:$0xff]  ;;  %s4201_s14 = sld [smem:[%s4379_s0 + %s3817_s10]]  }
 0x3a0   :  { %v3742_v36 = vpop.eup %3741  ;;  %v1443_v37 = vmul.f32 %v1439_v34, %v1411_v33  ;;  %v1441_v39 = vadd.f32 1.0, %v3740_v7 }
 0x3a1   :  { %v1444_v41 = vmul.f32 %v1440_v17, %v1412_v20  ;;  %v1442_v44 = vadd.f32 1.0, %v3742_v36 }
 0x3a2   :  { %3352 = vmatprep.mubr.msk.f32.mxu1 %vm379_vm1, %v1443_v37  ;;  %v1445_v47 = vmul.f32 %v1441_v39, %v1413_v38 }
 0x3a3   :  { %3353 = vmatmul.mubr.msk.f32.vlgmr.msra.gmra.mrb[4].mxu1 %vm379_vm1, %v1444_v41  ;;  %v1446_v49 = vmul.f32 %v1442_v44, %v1414_v48 }
 0x3a4   :  { %3355 = vmatprep.mubr.msk.f32.mxu1 %vm379_vm1, %v1445_v47  ;;  %3563 = vmatpush3.bf16.msra.mxu1 %v4091_v56 }
 0x3a5   :  { %3565 = vmatprep.subr.bf16.mxu1 %v3564_v45 }
 0x3a7   :  { %3356 = vmatmul.mubr.msk.f32.gmra.mrb[6].mxu1 %vm379_vm1, %v1446_v49 }
 0x3a8   :  { %3567 = vmatpush3.bf16.msra.mxu1 %v3564_v45  ;;  %3366 = vmatprep.mubr.msk.f32.mxu1 %vm379_vm1, %v1443_v37 }
 0x3ab   :  { %3367 = vmatmul.mubr.msk.f32.vlgmr.msra.gmra.mrb[8].mxu1 %vm379_vm1, %v1444_v41 }
 0x3ac   :  { %3369 = vmatprep.mubr.msk.f32.mxu1 %vm379_vm1, %v1445_v47 }
 0x3af   :  { %3370 = vmatmul.mubr.msk.f32.gmra.mrb[10].mxu1 %vm379_vm1, %v1446_v49 }
 0x476   :  { %v3354_v56 = vpop.f32.mrb[4].mxu1 }
 0x477   :  { %v1531_v53 = vpop.f32.mrb[5].mxu1  ;;  %v1537_v15 = vadd.f32 %v3354_v56, %v3037_v14 }
 0x478   :  { %v1532_v16 = vadd.f32 %v3037_v14, %v1531_v53 }
 0x479   :  { %v1658_v24 = vmul.f32 %v1537_v15, %v1537_v15 }
 0x47a   :  { %v3357_v55 = vpop.f32.mrb[6].mxu1  ;;  %v1657_v30 = vmul.f32 %v1532_v16, %v1532_v16 }
 0x47b   :  { %v1541_v54 = vpop.f32.mrb[7].mxu1  ;;  %v1547_v1 = vadd.f32 %v3357_v55, %v3037_v14 }
 0x47c   :  { %v1542_v19 = vadd.f32 %v3037_v14, %v1541_v54 }
 0x47d   :  { %v1660_v20 = vmul.f32 %v1547_v1, %v1547_v1 }
 0x47e   :  { %v3368_v60 = vpop.f32.mrb[8].mxu1  ;;  %v1659_v17 = vmul.f32 %v1542_v19, %v1542_v19 }
 0x47f   :  { %v1628_v61 = vadd.f32 %v3368_v60, %v3042_v52  ;;  %v1622_v62 = vpop.f32.mrb[9].mxu1 }
 0x480   :  { %v1623_v63 = vadd.f32 %v3042_v52, %v1622_v62 }
 0x481   :  { %v1643_v0 = vmul.f32 1.442695, %v1628_v61  ;;  %v1650_v39 = vsub.f32 0.0, %v1628_v61 }
 0x482   :  { %v1641_v2 = vmul.f32 1.442695, %v1623_v63  ;;  %v3371_v4 = vpop.f32.mrb[10].mxu1  ;;  %v1649_v47 = vsub.f32 0.0, %v1623_v63  ;;  %v243_v63 = vld [vmem:[%s4142_s18 + $0x8] sm:$0xff] }
 0x483   :  { %3743 = vpow2.f32 %v1643_v0  ;;  %v4133_v5 = vadd.f32 %v3371_v4, %v3042_v52  ;;  %v1632_v8 = vpop.f32.mrb[11].mxu1 }
 0x484   :  { %3745 = vpow2.f32 %v1641_v2  ;;  %v4135_v9 = vadd.f32 %v3042_v52, %v1632_v8  ;;  %v242_v2 = vld [vmem:[%s4142_s18] sm:$0xff] }
 0x485   :  { %v1647_v12 = vmul.f32 1.442695, %v4133_v5  ;;  %v1652_v61 = vsub.f32 0.0, %v4133_v5 }
 0x486   :  { %v1645_v13 = vmul.f32 1.442695, %v4135_v9  ;;  %v1651_v4 = vsub.f32 0.0, %v4135_v9 }
 0x487   :  { %3747 = vpow2.f32 %v1647_v12 }
 0x488   :  { %3749 = vpow2.f32 %v1645_v13  ;;  %v3568_v13 = vpack.c.bf16 %v243_v63, %v242_v2 }
 0x48a   :  { %3569 = vmatprep.subr.bf16.mxu1 %v3568_v13 }
 0x48b   :  { %3571 = vmatpush3.bf16.msra.mxu1 %v3568_v13 }
 0x48d   :  { %v3744_v3 = vpop.eup %3743 }
 0x48e   :  { %v3746_v22 = vpop.eup %3745  ;;  %v1682_v28 = vmul.f32 %v3744_v3, %v1678_v58  ;;  %v1654_v29 = vmul.f32 %v3744_v3, %v3744_v3  ;;  %v245_v58 = vld [vmem:[%s4142_s18 + $0x18] sm:$0xff] }
 0x48f   :  { %v1681_v32 = vmul.f32 %v3746_v22, %v1677_v46  ;;  %v1653_v33 = vmul.f32 %v3746_v22, %v3746_v22 }
 0x490   :  { %v1686_v34 = vadd.f32 %v1682_v28, %v1537_v15  ;;  %v1662_v10 = vadd.f32 %v1658_v24, %v1654_v29 }
 0x491   :  { %v3748_v7 = vpop.eup %3747  ;;  %v1685_v36 = vadd.f32 %v1681_v32, %v1532_v16  ;;  %v1661_v37 = vadd.f32 %v1657_v30, %v1653_v33  ;;  %v244_v16 = vld [vmem:[%s4142_s18 + $0x10] sm:$0xff]  ;;  %s2998_s18 = sld [smem:[%s4379_s0 + %s3818_s15]]  }
 0x492   :  { %v3750_v38 = vpop.eup %3749  ;;  %v1666_v41 = vmul.f32 0.5, %v1662_v10  ;;  %v1684_v44 = vmul.f32 %v3748_v7, %v1680_v6  ;;  %v1656_v45 = vmul.f32 %v3748_v7, %v3748_v7  ;;  %v3572_v46 = vpack.c.bf16 %v245_v58, %v244_v16 }
 0x493   :  { %3374 = vmatprep.mubr.msk.f32.mxu0 %vm1689_vm4, %v1685_v36  ;;  %v1683_v48 = vmul.f32 %v3750_v38, %v1679_v35  ;;  %v1665_v49 = vmul.f32 0.5, %v1661_v37  ;;  %v1655_v51 = vmul.f32 %v3750_v38, %v3750_v38 }
 0x494   :  { %3375 = vmatmul.mubr.msk.f32.vlgmr.msra.gmra.mrb[8].mxu0 %vm1689_vm4, %v1686_v34  ;;  %v1670_v56 = vadd.f32 %v1666_v41, %v1650_v39  ;;  %v1688_v53 = vadd.f32 %v1684_v44, %v1547_v1  ;;  %v1664_v55 = vadd.f32 %v1660_v20, %v1656_v45  ;;  %3573 = vmatprep.subr.bf16.mxu1 %v3572_v46  ;;  %v3055_v1 = vld [vmem:[%s2988_s23] ss:$0 sm:$0xff]  ;;  %s4252_s23 = sld [smem:[%s4379_s0 + %s3819_s20]]  }
 0x495   :  { %v1687_v54 = vadd.f32 %v1683_v48, %v1542_v19  ;;  %v1669_v52 = vadd.f32 %v1665_v49, %v1649_v47  ;;  %v1663_v60 = vadd.f32 %v1659_v17, %v1655_v51  ;;  %3575 = vmatpush3.bf16.msra.mxu1 %v3572_v46  ;;  %v248_v20 = vld [vmem:[%s4175_s1] sm:$0xff]  ;;  %v249_v17 = vld [vmem:[%s4175_s1 + $0x8] sm:$0xff] }
 0x496   :  { %v3048_v62 = vadd.f32 -0.5, %v1670_v56  ;;  %v1668_v0 = vmul.f32 0.5, %v1664_v55  ;;  %v4179_v36 = vpack.c.bf16 %v249_v17, %v248_v20 }
 0x497   :  { %3377 = vmatprep.mubr.msk.f32.mxu0 %vm1689_vm4, %v1687_v54  ;;  %v3047_v8 = vadd.f32 -0.5, %v1669_v52  ;;  %v1667_v12 = vmul.f32 0.5, %v1663_v60 }
 0x498   :  { %2945 = vrot.lane.b32.xlu1 %v3048_v62, %s3811_s19  ;;  %3378 = vmatmul.mubr.msk.f32.gmra.mrb[10].mxu0 %vm1689_vm4, %v1688_v53  ;;  %v1672_v14 = vadd.f32 %v1668_v0, %v1652_v61 }
 0x499   :  { %2943 = vrot.lane.b32.xlu0 %v3047_v8, %s3811_s19  ;;  %v1671_v5 = vadd.f32 %v1667_v12, %v1651_v4 }
 0x49a   :  { %v3050_v15 = vadd.f32 -0.5, %v1672_v14 }
 0x49b   :  { %v3049_v9 = vadd.f32 -0.5, %v1671_v5 }
 0x49c   :  { %2949 = vrot.lane.b32.xlu1 %v3050_v15, %s3811_s19 }
 0x49d   :  { %2947 = vrot.lane.b32.xlu0 %v3049_v9, %s3811_s19  ;;  %s3821_s19 = smov 36  }
 0x49e   :  { %s4279_s3 = sld [smem:[%s4379_s0 + %s3821_s19]]  }
 0x567   :  { %v3376_v3 = vpop.f32.mrb[8].mxu0 }
 0x568   :  { %v1788_v19 = vadd.f32 %v3376_v3, %v3884_v25  ;;  %v1768_v22 = vpop.f32.mrb[9].mxu0  ;;  %v253_v25 = vld [vmem:[%s2993_s27 + $0x8] sm:$0xff] }
 0x569   :  { %v1787_v24 = vadd.f32 %v1768_v22, %v3875_v18  ;;  %v252_v18 = vld [vmem:[%s2993_s27] sm:$0xff] }
 0x56a   :  { %v1798_v30 = vadd.f32 %v3055_v1, %v1788_v19  ;;  %v3576_v10 = vpack.c.bf16 %v253_v25, %v252_v18 }
 0x56b   :  { %v1797_v28 = vadd.f32 %v3055_v1, %v1787_v24  ;;  %v3379_v29 = vpop.f32.mrb[10].mxu0 }
 0x56c   :  { %v1790_v32 = vadd.f32 %v3379_v29, %v3896_v31  ;;  %v1778_v6 = vpop.f32.mrb[11].mxu0  ;;  %v254_v31 = vld [vmem:[%s2993_s27 + $0x10] sm:$0xff]  ;;  %3577 = vmatprep.subr.bf16.mxu0 %v3576_v10 }
 0x56d   :  { %v1789_v33 = vadd.f32 %v1778_v6, %v3888_v26  ;;  %3388 = vmatprep.mubr.msk.f32.mxu1 %vm379_vm1, %v1797_v28  ;;  %v255_v26 = vld [vmem:[%s2993_s27 + $0x18] sm:$0xff]  ;;  %3579 = vmatpush3.bf16.msra.mxu0 %v3576_v10  ;;  %s3820_s27 = smov 33  }
 0x56e   :  { %3389 = vmatmul.mubr.msk.f32.vlgmr.msra.gmra.mrb[12].mxu1 %vm379_vm1, %v1798_v30  ;;  %v1800_v35 = vadd.f32 %v3055_v1, %v1790_v32  ;;  %v3580_v7 = vpack.c.bf16 %v255_v26, %v254_v31  ;;  %v246_v32 = vld [vmem:[%s2990_s5] sm:$0x1]  ;;  %s2996_s30 = sld [smem:[%s4379_s0 + %s3820_s27]]  }
 0x56f   :  { %v1799_v34 = vadd.f32 %v3055_v1, %v1789_v33 }
 0x570   :  { %3581 = vmatprep.subr.bf16.mxu0 %v3580_v7 }
 0x571   :  { %3391 = vmatprep.mubr.msk.f32.mxu1 %vm379_vm1, %v1799_v34  ;;  %3583 = vmatpush3.bf16.msra.mxu0 %v3580_v7  ;;  %v247_v34 = vld [vmem:[%s2991_s9] sm:$0x1] }
 0x572   :  { %3392 = vmatmul.mubr.msk.f32.gmra.mrb[14].mxu1 %vm379_vm1, %v1800_v35  ;;  %3585 = vmatprep.subr.bf16.mxu0 %v4179_v36 }
 0x641   :  { %v3390_v37 = vpop.f32.mrb[12].mxu1 }
 0x642   :  { %v1899_v38 = vsel %vm379_vm1, %v3390_v37, 0.0  ;;  %v1913_v39 = vmul.f32 %v3390_v37, %v3390_v37  ;;  %v1879_v41 = vpop.f32.mrb[13].mxu1 }
 0x643   :  { %v1898_v44 = vsel %vm379_vm1, %v1879_v41, 0.0  ;;  %v1912_v45 = vmul.f32 %v1879_v41, %v1879_v41 }
 0x644   :  { %v1917_v47 = vsel %vm379_vm1, %v1913_v39, 0.0  ;;  %v1900_v48 = vadd.f32 %v1899_v38, %v1898_v44 }
 0x645   :  { %v1916_v49 = vsel %vm379_vm1, %v1912_v45, 0.0  ;;  %v3393_v51 = vpop.f32.mrb[14].mxu1 }
 0x646   :  { %v1918_v56 = vadd.f32 %v1917_v47, %v1916_v49  ;;  %v1889_v53 = vpop.f32.mrb[15].mxu1  ;;  %v1915_v55 = vmul.f32 %v3393_v51, %v3393_v51  ;;  %v1903_v61 = vsel %vm379_vm1, %v3393_v51, 0.0 }
 0x647   :  { %v1901_v54 = vsel %vm379_vm1, %v1889_v53, 0.0  ;;  %v1914_v52 = vmul.f32 %v1889_v53, %v1889_v53 }
 0x648   :  { %v1902_v60 = vadd.f32 %v1901_v54, %v1900_v48  ;;  %v1921_v63 = vsel %vm379_vm1, %v1915_v55, 0.0 }
 0x649   :  { %v1919_v62 = vsel %vm379_vm1, %v1914_v52, 0.0 }
 0x64a   :  { %v1904_v0 = vadd.f32 %v1903_v61, %v1902_v60  ;;  %v1920_v2 = vadd.f32 %v1919_v62, %v1918_v56 }
 0x64c   :  { %v1905_v4 = vrot.slane %v1904_v0, 4  ;;  %v1922_v8 = vadd.f32 %v1921_v63, %v1920_v2 }
 0x64e   :  { %v1906_v12 = vadd.f32 %v1905_v4, %v1904_v0  ;;  %v1923_v13 = vrot.slane %v1922_v8, 4 }
 0x650   :  { %v1907_v14 = vrot.slane %v1906_v12, 2  ;;  %v1924_v5 = vadd.f32 %v1923_v13, %v1922_v8 }
 0x652   :  { %v1908_v15 = vadd.f32 %v1907_v14, %v1906_v12  ;;  %v1925_v9 = vrot.slane %v1924_v5, 2 }
 0x654   :  { %v1909_v16 = vrot.slane %v1908_v15, 1  ;;  %v1926_v58 = vadd.f32 %v1925_v9, %v1924_v5 }
 0x656   :  { %v1910_v46 = vadd.f32 %v1909_v16, %v1908_v15  ;;  %v1927_v3 = vrot.slane %v1926_v58, 1 }
 0x658   :  { %v1911_v1 = vmul.f32 0.03125, %v1910_v46  ;;  %v1928_v19 = vadd.f32 %v1927_v3, %v1926_v58  ;;  %v250_v58 = vld [vmem:[%s4175_s1 + $0x10] sm:$0xff]  ;;  %v251_v46 = vld [vmem:[%s4175_s1 + $0x18] sm:$0xff] }
 0x65a   :  { %v1929_v22 = vmul.f32 0.03125, %v1928_v19  ;;  %v1930_v24 = vmul.f32 %v1911_v1, %v1911_v1 }
 0x65c   :  { %v1931_v28 = vsub.f32 %v1929_v22, %v1930_v24 }
 0x65e   :  { %v1932_v29 = vmax.f32 %v1931_v28, 0.0 }
 0x660   :  { %v1933_v30 = vadd.f32 1e-05, %v1932_v29 }
 0x662   :  { %3751 = vrsqrt.f32 %v1933_v30 }
 0x66c   :  { %v3752_v6 = vpop.eup %3751 }
 0x66d   :  { %v1935_v33 = vmul.f32 %v3752_v6, %v246_v32  ;;  %v3588_v6 = vpack.c.bf16 %v251_v46, %v250_v58 }
 0x66f   :  { %v1936_v35 = vmul.f32 %v1935_v33, %v1911_v1  ;;  %v1942_v18 = vrot.slane %v1935_v33, %v3934_v23 }
 0x671   :  { %v1937_v25 = vsub.f32 %v247_v34, %v1936_v35  ;;  %v1944_v31 = vmul.f32 %v1942_v18, %v1879_v41  ;;  %v1945_v10 = vmul.f32 %v3390_v37, %v1942_v18  ;;  %v1946_v26 = vmul.f32 %v1942_v18, %v1889_v53 }
 0x672   :  { %v1947_v7 = vmul.f32 %v3393_v51, %v1942_v18 }
 0x673   :  { %v1952_v20 = vrot.slane %v1937_v25, %v3934_v23  ;;  %v256_v25 = vld [vmem:[%s4201_s14] sm:$0xff] }
 0x675   :  { %v1954_v17 = vadd.f32 %v1952_v20, %v1944_v31  ;;  %v1955_v38 = vadd.f32 %v1952_v20, %v1945_v10  ;;  %v1956_v39 = vadd.f32 %v1952_v20, %v1946_v26  ;;  %v1957_v44 = vadd.f32 %v1952_v20, %v1947_v7  ;;  %v257_v31 = vld [vmem:[%s4201_s14 + $0x8] sm:$0xff] }
 0x677   :  { %v1963_v45 = vmul.f32 0.044715, %v1955_v38  ;;  %v1964_v47 = vmul.f32 0.044715, %v1956_v39  ;;  %v1962_v48 = vmul.f32 0.044715, %v1954_v17 }
 0x678   :  { %v1965_v49 = vmul.f32 0.044715, %v1957_v44  ;;  %v1959_v14 = vmul.f32 0.5, %v1955_v38  ;;  %v1958_v9 = vmul.f32 0.5, %v1954_v17  ;;  %v1960_v19 = vmul.f32 0.5, %v1956_v39 }
 0x679   :  { %v1967_v56 = vmul.f32 %v1963_v45, %v1955_v38  ;;  %v1968_v55 = vmul.f32 %v1964_v47, %v1956_v39  ;;  %v1966_v54 = vmul.f32 %v1962_v48, %v1954_v17  ;;  %v1961_v28 = vmul.f32 0.5, %v1957_v44 }
 0x67a   :  { %v1969_v52 = vmul.f32 %v1965_v49, %v1957_v44  ;;  %v259_v49 = vld [vmem:[%s4201_s14 + $0x18] sm:$0xff] }
 0x67b   :  { %v1971_v60 = vmul.f32 %v1967_v56, %v1955_v38  ;;  %v1972_v61 = vmul.f32 %v1968_v55, %v1956_v39  ;;  %v1970_v41 = vmul.f32 %v1966_v54, %v1954_v17 }
 0x67c   :  { %v1973_v37 = vmul.f32 %v1969_v52, %v1957_v44 }
 0x67d   :  { %v1975_v53 = vadd.f32 %v1971_v60, %v1955_v38  ;;  %v1976_v51 = vadd.f32 %v1972_v61, %v1956_v39  ;;  %v1974_v62 = vadd.f32 %v1970_v41, %v1954_v17  ;;  %v3592_v39 = vpack.c.bf16 %v257_v31, %v256_v25 }
 0x67e   :  { %v1977_v0 = vadd.f32 %v1973_v37, %v1957_v44 }
 0x67f   :  { %v1979_v2 = vmul.f32 0.7978846, %v1975_v53  ;;  %v1980_v63 = vmul.f32 0.7978846, %v1976_v51  ;;  %v1978_v4 = vmul.f32 0.7978846, %v1974_v62 }
 0x680   :  { %v1981_v8 = vmul.f32 0.7978846, %v1977_v0  ;;  %v266_v0 = vld [vmem:[%s2998_s18] sm:$0xff] }
 0x681   :  { %3753 = vtanh.f32 %v1979_v2  ;;  %v267_v2 = vld [vmem:[%s2998_s18 + $0x8] sm:$0xff] }
 0x682   :  { %3755 = vtanh.f32 %v1978_v4  ;;  %v3600_v4 = vpack.c.bf16 %v267_v2, %v266_v0 }
 0x683   :  { %3757 = vtanh.f32 %v1980_v63  ;;  %v268_v63 = vld [vmem:[%s2998_s18 + $0x10] sm:$0xff] }
 0x684   :  { %3759 = vtanh.f32 %v1981_v8  ;;  %v269_v8 = vld [vmem:[%s2998_s18 + $0x18] sm:$0xff]  ;;  %3601 = vmatprep.subr.bf16.mxu1 %v3600_v4 }
 0x685   :  { %3603 = vmatpush3.bf16.msra.mxu1 %v3600_v4 }
 0x68b   :  { %v3754_v12 = vpop.eup %3753 }
 0x68c   :  { %v3756_v13 = vpop.eup %3755  ;;  %v1987_v5 = vadd.f32 1.0, %v3754_v12  ;;  %v3604_v12 = vpack.c.bf16 %v269_v8, %v268_v63 }
 0x68d   :  { %v3758_v15 = vpop.eup %3757  ;;  %v1986_v16 = vadd.f32 1.0, %v3756_v13  ;;  %v262_v13 = vld [vmem:[%s4252_s23] sm:$0xff] }
 0x68e   :  { %v3760_v3 = vpop.eup %3759  ;;  %v1991_v1 = vmul.f32 %v1987_v5, %v1959_v14  ;;  %v1988_v22 = vadd.f32 1.0, %v3758_v15  ;;  %3605 = vmatprep.subr.bf16.mxu1 %v3604_v12  ;;  %v263_v14 = vld [vmem:[%s4252_s23 + $0x8] sm:$0xff] }
 0x68f   :  { %v1990_v24 = vmul.f32 %v1986_v16, %v1958_v9  ;;  %v1989_v29 = vadd.f32 1.0, %v3760_v3  ;;  %3607 = vmatpush3.bf16.msra.mxu1 %v3604_v12  ;;  %v4256_v5 = vpack.c.bf16 %v263_v14, %v262_v13 }
 0x690   :  { %v1995_v30 = vrot.slane %v1991_v1, 7  ;;  %v1992_v32 = vmul.f32 %v1988_v22, %v1960_v19  ;;  %v2007_v33 = vrot.slane %v1991_v1, 1 }
 0x691   :  { %v1994_v34 = vrot.slane %v1990_v24, 7  ;;  %v2006_v35 = vrot.slane %v1990_v24, 1  ;;  %3402 = vmatprep.mubr.msk.f32.mxu0 %vm379_vm1, %v1990_v24  ;;  %v1993_v18 = vmul.f32 %v1989_v29, %v1961_v28  ;;  %3609 = vmatprep.subr.bf16.mxu1 %v4256_v5 }
 0x692   :  { %3403 = vmatmul.mubr.msk.f32.vlgmr.msra.gmra.mrb[12].mxu0 %vm379_vm1, %v1991_v1  ;;  %v1996_v10 = vrot.slane %v1992_v32, 7  ;;  %v2008_v26 = vrot.slane %v1992_v32, 1 }
 0x693   :  { %v2000_v7 = vsel %vm579_vm2, %v1994_v34, %v1995_v30  ;;  %3405 = vmatprep.mubr.msk.f32.mxu0 %vm379_vm1, %v1992_v32  ;;  %3587 = vmatpush3.bf16.msra.mxu0 %v4179_v36  ;;  %v1997_v20 = vrot.slane %v1993_v18, 7  ;;  %v2009_v17 = vrot.slane %v1993_v18, 1  ;;  %v2012_v38 = vsel %vm612_vm3, %v2006_v35, %v2007_v33  ;;  %v258_v36 = vld [vmem:[%s4201_s14 + $0x10] sm:$0xff] }
 0x694   :  { %3589 = vmatprep.subr.bf16.mxu0 %v3588_v6  ;;  %v1999_v44 = vsel %vm579_vm2, %v1995_v30, %v1996_v10  ;;  %v2011_v45 = vsel %vm612_vm3, %v2007_v33, %v2008_v26  ;;  %v2003_v52 = vmul.f32 %v2000_v7, %v3963_v40  ;;  %v3596_v60 = vpack.c.bf16 %v259_v49, %v258_v36 }
 0x695   :  { %v2001_v47 = vsel %vm579_vm2, %v1997_v20, %v1994_v34  ;;  %v1998_v48 = vsel %vm579_vm2, %v1996_v10, %v1997_v20  ;;  %v2010_v55 = vsel %vm612_vm3, %v2008_v26, %v2009_v17  ;;  %v2013_v54 = vsel %vm612_vm3, %v2009_v17, %v2006_v35 }
 0x696   :  { %3406 = vmatmul.mubr.msk.f32.gmra.mrb[14].mxu0 %vm379_vm1, %v1993_v18  ;;  %v2002_v56 = vmul.f32 %v2001_v47, %v3944_v11  ;;  %v2004_v61 = vmul.f32 %v1999_v44, %v3949_v27  ;;  %v2005_v41 = vmul.f32 %v1998_v48, %v3976_v50  ;;  %v2014_v37 = vmul.f32 %v2012_v38, %v3982_v42 }
 0x697   :  { %3591 = vmatpush3.bf16.msra.mxu0 %v3588_v6  ;;  %v2015_v53 = vmul.f32 %v2011_v45, %v3987_v43  ;;  %v2016_v51 = vmul.f32 %v2010_v55, %v3992_v57  ;;  %v2017_v62 = vmul.f32 %v2013_v54, %v3997_v59 }
 0x698   :  { %3416 = vmatprep.mubr.msk.f32.mxu0 %vm379_vm1, %v2002_v56  ;;  %3593 = vmatprep.subr.bf16.mxu0 %v3592_v39 }
 0x69a   :  { %3417 = vmatmul.mubr.msk.f32.vlgmr.msra.gmra.mrb[12].mxu0 %vm379_vm1, %v2003_v52 }
 0x69b   :  { %3419 = vmatprep.mubr.msk.f32.mxu0 %vm379_vm1, %v2004_v61  ;;  %3595 = vmatpush3.bf16.msra.mxu0 %v3592_v39 }
 0x69c   :  { %3597 = vmatprep.subr.bf16.mxu0 %v3596_v60 }
 0x69e   :  { %3420 = vmatmul.mubr.msk.f32.gmra.mrb[14].mxu0 %vm379_vm1, %v2005_v41  ;;  %v260_v41 = vld [vmem:[%s2995_s26] sm:$0x1] }
 0x69f   :  { %3599 = vmatpush3.bf16.msra.mxu0 %v3596_v60  ;;  %3430 = vmatprep.mubr.msk.f32.mxu0 %vm379_vm1, %v2014_v37 }
 0x6a2   :  { %3431 = vmatmul.mubr.msk.f32.vlgmr.msra.gmra.mrb[12].mxu0 %vm379_vm1, %v2015_v53 }
 0x6a3   :  { %3433 = vmatprep.mubr.msk.f32.mxu0 %vm379_vm1, %v2016_v51  ;;  %v261_v51 = vld [vmem:[%s2996_s30] sm:$0x1] }
 0x6a6   :  { %3434 = vmatmul.mubr.msk.f32.gmra.mrb[14].mxu0 %vm379_vm1, %v2017_v62 }
 0x775   :  { %v3432_v15 = vpop.f32.mrb[12].mxu0 }
 0x776   :  { %v2314_v9 = vsel %vm379_vm1, %v3432_v15, 0.0  ;;  %v2328_v16 = vmul.f32 %v3432_v15, %v3432_v15  ;;  %v2290_v58 = vpop.f32.mrb[13].mxu0 }
 0x777   :  { %v2313_v46 = vsel %vm379_vm1, %v2290_v58, 0.0  ;;  %v2327_v3 = vmul.f32 %v2290_v58, %v2290_v58 }
 0x778   :  { %v2332_v1 = vsel %vm379_vm1, %v2328_v16, 0.0  ;;  %v2315_v19 = vadd.f32 %v2314_v9, %v2313_v46 }
 0x779   :  { %v2331_v22 = vsel %vm379_vm1, %v2327_v3, 0.0  ;;  %v3435_v24 = vpop.f32.mrb[14].mxu0 }
 0x77a   :  { %v2333_v28 = vadd.f32 %v2332_v1, %v2331_v22  ;;  %v2300_v29 = vpop.f32.mrb[15].mxu0  ;;  %v2330_v30 = vmul.f32 %v3435_v24, %v3435_v24  ;;  %v2318_v34 = vsel %vm379_vm1, %v3435_v24, 0.0 }
 0x77b   :  { %v2316_v32 = vsel %vm379_vm1, %v2300_v29, 0.0  ;;  %v2329_v6 = vmul.f32 %v2300_v29, %v2300_v29 }
 0x77c   :  { %v2317_v33 = vadd.f32 %v2316_v32, %v2315_v19  ;;  %v2336_v31 = vsel %vm379_vm1, %v2330_v30, 0.0 }
 0x77d   :  { %v2334_v35 = vsel %vm379_vm1, %v2329_v6, 0.0 }
 0x77e   :  { %v2319_v18 = vadd.f32 %v2318_v34, %v2317_v33  ;;  %v2335_v25 = vadd.f32 %v2334_v35, %v2333_v28 }
 0x780   :  { %v2320_v10 = vrot.slane %v2319_v18, 4  ;;  %v2337_v26 = vadd.f32 %v2336_v31, %v2335_v25 }
 0x782   :  { %v2321_v7 = vadd.f32 %v2320_v10, %v2319_v18  ;;  %v2338_v20 = vrot.slane %v2337_v26, 4 }
 0x784   :  { %v2322_v17 = vrot.slane %v2321_v7, 2  ;;  %v2339_v38 = vadd.f32 %v2338_v20, %v2337_v26 }
 0x786   :  { %v2323_v39 = vadd.f32 %v2322_v17, %v2321_v7  ;;  %v2340_v44 = vrot.slane %v2339_v38, 2 }
 0x788   :  { %v2324_v45 = vrot.slane %v2323_v39, 1  ;;  %v2341_v47 = vadd.f32 %v2340_v44, %v2339_v38 }
 0x78a   :  { %v2325_v48 = vadd.f32 %v2324_v45, %v2323_v39  ;;  %v2342_v36 = vrot.slane %v2341_v47, 1 }
 0x78c   :  { %v2326_v49 = vmul.f32 0.03125, %v2325_v48  ;;  %v2343_v56 = vadd.f32 %v2342_v36, %v2341_v47  ;;  %v264_v47 = vld [vmem:[%s4252_s23 + $0x10] sm:$0xff]  ;;  %v265_v48 = vld [vmem:[%s4252_s23 + $0x18] sm:$0xff] }
 0x78e   :  { %v2344_v55 = vmul.f32 0.03125, %v2343_v56  ;;  %v2345_v54 = vmul.f32 %v2326_v49, %v2326_v49 }
 0x790   :  { %v2346_v52 = vsub.f32 %v2344_v55, %v2345_v54 }
 0x792   :  { %v2347_v60 = vmax.f32 %v2346_v52, 0.0 }
 0x794   :  { %v2348_v61 = vadd.f32 1e-05, %v2347_v60 }
 0x796   :  { %3761 = vrsqrt.f32 %v2348_v61 }
 0x7a0   :  { %v3762_v37 = vpop.eup %3761 }
 0x7a1   :  { %v2350_v53 = vmul.f32 %v3762_v37, %v260_v41  ;;  %v3612_v37 = vpack.c.bf16 %v265_v48, %v264_v47 }
 0x7a3   :  { %v2351_v62 = vmul.f32 %v2350_v53, %v2326_v49  ;;  %v2357_v0 = vrot.slane %v2350_v53, %v3934_v23 }
 0x7a5   :  { %v2352_v2 = vsub.f32 %v261_v51, %v2351_v62  ;;  %v2359_v63 = vmul.f32 %v2357_v0, %v2290_v58  ;;  %v2360_v4 = vmul.f32 %v3432_v15, %v2357_v0  ;;  %v2361_v8 = vmul.f32 %v2357_v0, %v2300_v29 }
 0x7a6   :  { %v2362_v12 = vmul.f32 %v3435_v24, %v2357_v0 }
 0x7a7   :  { %v2367_v13 = vrot.slane %v2352_v2, %v3934_v23  ;;  %v270_v2 = vld [vmem:[%s4279_s3] sm:$0xff] }
 0x7a9   :  { %v2369_v14 = vadd.f32 %v2367_v13, %v2359_v63  ;;  %v2370_v9 = vadd.f32 %v2367_v13, %v2360_v4  ;;  %v2371_v16 = vadd.f32 %v2367_v13, %v2361_v8  ;;  %v2372_v46 = vadd.f32 %v2367_v13, %v2362_v12  ;;  %v271_v63 = vld [vmem:[%s4279_s3 + $0x8] sm:$0xff] }
 0x7ab   :  { %v2378_v3 = vmul.f32 0.044715, %v2370_v9  ;;  %v2379_v1 = vmul.f32 0.044715, %v2371_v16  ;;  %v2377_v19 = vmul.f32 0.044715, %v2369_v14 }
 0x7ac   :  { %v2380_v22 = vmul.f32 0.044715, %v2372_v46  ;;  %v2374_v17 = vmul.f32 0.5, %v2370_v9  ;;  %v2373_v44 = vmul.f32 0.5, %v2369_v14  ;;  %v2375_v56 = vmul.f32 0.5, %v2371_v16 }
 0x7ad   :  { %v2382_v28 = vmul.f32 %v2378_v3, %v2370_v9  ;;  %v2383_v30 = vmul.f32 %v2379_v1, %v2371_v16  ;;  %v2381_v32 = vmul.f32 %v2377_v19, %v2369_v14  ;;  %v2376_v52 = vmul.f32 0.5, %v2372_v46 }
 0x7ae   :  { %v2384_v6 = vmul.f32 %v2380_v22, %v2372_v46  ;;  %v273_v22 = vld [vmem:[%s4279_s3 + $0x18] sm:$0xff] }
 0x7af   :  { %v2386_v33 = vmul.f32 %v2382_v28, %v2370_v9  ;;  %v2387_v34 = vmul.f32 %v2383_v30, %v2371_v16  ;;  %v2385_v58 = vmul.f32 %v2381_v32, %v2369_v14 }
 0x7b0   :  { %v2388_v15 = vmul.f32 %v2384_v6, %v2372_v46 }
 0x7b1   :  { %v2390_v29 = vadd.f32 %v2386_v33, %v2370_v9  ;;  %v2391_v24 = vadd.f32 %v2387_v34, %v2371_v16  ;;  %v2389_v35 = vadd.f32 %v2385_v58, %v2369_v14  ;;  %v3616_v16 = vpack.c.bf16 %v271_v63, %v270_v2 }
 0x7b2   :  { %v2392_v18 = vadd.f32 %v2388_v15, %v2372_v46  ;;  %v278_v15 = vld [vmem:[%s3002_s7 + $0x10] sm:$0xff] }
 0x7b3   :  { %v2394_v25 = vmul.f32 0.7978846, %v2390_v29  ;;  %v2395_v31 = vmul.f32 0.7978846, %v2391_v24  ;;  %v2393_v10 = vmul.f32 0.7978846, %v2389_v35 }
 0x7b4   :  { %v2396_v26 = vmul.f32 0.7978846, %v2392_v18 }
 0x7b5   :  { %3763 = vtanh.f32 %v2394_v25 }
 0x7b6   :  { %3765 = vtanh.f32 %v2393_v10 }
 0x7b7   :  { %3767 = vtanh.f32 %v2395_v31 }
 0x7b8   :  { %3769 = vtanh.f32 %v2396_v26 }
 0x7bf   :  { %v3764_v7 = vpop.eup %3763 }
 0x7c0   :  { %v3766_v20 = vpop.eup %3765  ;;  %v2402_v38 = vadd.f32 1.0, %v3764_v7 }
 0x7c1   :  { %v3768_v39 = vpop.eup %3767  ;;  %v2401_v45 = vadd.f32 1.0, %v3766_v20 }
 0x7c2   :  { %v3770_v36 = vpop.eup %3769  ;;  %v2406_v49 = vmul.f32 %v2402_v38, %v2374_v17  ;;  %v2403_v55 = vadd.f32 1.0, %v3768_v39 }
 0x7c3   :  { %v2405_v54 = vmul.f32 %v2401_v45, %v2373_v44  ;;  %v2404_v60 = vadd.f32 1.0, %v3770_v36 }
 0x7c4   :  { %v2410_v61 = vrot.slane %v2406_v49, 7  ;;  %v2407_v41 = vmul.f32 %v2403_v55, %v2375_v56  ;;  %v2422_v53 = vrot.slane %v2406_v49, 1 }
 0x7c5   :  { %v2409_v51 = vrot.slane %v2405_v54, 7  ;;  %v2421_v62 = vrot.slane %v2405_v54, 1  ;;  %3444 = vmatprep.mubr.msk.f32.mxu1 %vm379_vm1, %v2405_v54  ;;  %v2408_v0 = vmul.f32 %v2404_v60, %v2376_v52 }
 0x7c6   :  { %3445 = vmatmul.mubr.msk.f32.vlgmr.msra.gmra.mrb[16].mxu1 %vm379_vm1, %v2406_v49  ;;  %v2411_v4 = vrot.slane %v2407_v41, 7  ;;  %v2423_v8 = vrot.slane %v2407_v41, 1 }
 0x7c7   :  { %v2415_v12 = vsel %vm579_vm2, %v2409_v51, %v2410_v61  ;;  %3447 = vmatprep.mubr.msk.f32.mxu1 %vm379_vm1, %v2407_v41  ;;  %3611 = vmatpush3.bf16.msra.mxu1 %v4256_v5  ;;  %v2412_v13 = vrot.slane %v2408_v0, 7  ;;  %v2424_v14 = vrot.slane %v2408_v0, 1  ;;  %v2427_v9 = vsel %vm612_vm3, %v2421_v62, %v2422_v53  ;;  %v272_v5 = vld [vmem:[%s4279_s3 + $0x10] sm:$0xff] }
 0x7c8   :  { %3613 = vmatprep.subr.bf16.mxu1 %v3612_v37  ;;  %v2414_v46 = vsel %vm579_vm2, %v2410_v61, %v2411_v4  ;;  %v2426_v3 = vsel %vm612_vm3, %v2422_v53, %v2423_v8  ;;  %v2418_v6 = vmul.f32 %v2415_v12, %v3963_v40  ;;  %v3620_v33 = vpack.c.bf16 %v273_v22, %v272_v5 }
 0x7c9   :  { %v2416_v1 = vsel %vm579_vm2, %v2412_v13, %v2409_v51  ;;  %v2413_v19 = vsel %vm579_vm2, %v2411_v4, %v2412_v13  ;;  %v2425_v30 = vsel %vm612_vm3, %v2423_v8, %v2424_v14  ;;  %v2428_v32 = vsel %vm612_vm3, %v2424_v14, %v2421_v62 }
 0x7ca   :  { %3448 = vmatmul.mubr.msk.f32.gmra.mrb[18].mxu1 %vm379_vm1, %v2408_v0  ;;  %v2417_v28 = vmul.f32 %v2416_v1, %v3944_v11  ;;  %v2419_v34 = vmul.f32 %v2414_v46, %v3949_v27  ;;  %v2420_v11 = vmul.f32 %v2413_v19, %v3976_v50  ;;  %v2429_v21 = vmul.f32 %v2427_v9, %v3982_v42  ;;  %v276_v50 = vld [vmem:[%s3002_s7] sm:$0xff]  ;;  %v277_v42 = vld [vmem:[%s3002_s7 + $0x8] sm:$0xff] }
 0x7cb   :  { %3615 = vmatpush3.bf16.msra.mxu1 %v3612_v37  ;;  %v2430_v40 = vmul.f32 %v2426_v3, %v3987_v43  ;;  %v2431_v58 = vmul.f32 %v2425_v30, %v3992_v57  ;;  %v2432_v27 = vmul.f32 %v2428_v32, %v3997_v59  ;;  %v3624_v29 = vpack.c.bf16 %v277_v42, %v276_v50  ;;  %v279_v43 = vld [vmem:[%s3002_s7 + $0x18] sm:$0xff]  ;;  %v274_v46 = vld [vmem:[%s3000_s11] sm:$0x1] }
 0x7cc   :  { %3458 = vmatprep.mubr.msk.f32.mxu1 %vm379_vm1, %v2417_v28  ;;  %3617 = vmatprep.subr.bf16.mxu1 %v3616_v16  ;;  %v3628_v24 = vpack.c.bf16 %v279_v43, %v278_v15  ;;  %v275_v19 = vld [vmem:[%s3001_s16] sm:$0x1] }
 0x7cd   :  { %3625 = vmatprep.subr.bf16.mxu0 %v3624_v29 }
 0x7ce   :  { %3459 = vmatmul.mubr.msk.f32.vlgmr.msra.gmra.mrb[16].mxu1 %vm379_vm1, %v2418_v6  ;;  %3627 = vmatpush3.bf16.msra.mxu0 %v3624_v29 }
 0x7cf   :  { %3461 = vmatprep.mubr.msk.f32.mxu1 %vm379_vm1, %v2419_v34  ;;  %3619 = vmatpush3.bf16.msra.mxu1 %v3616_v16 }
 0x7d0   :  { %3621 = vmatprep.subr.bf16.mxu1 %v3620_v33  ;;  %3629 = vmatprep.subr.bf16.mxu0 %v3628_v24 }
 0x7d2   :  { %3462 = vmatmul.mubr.msk.f32.gmra.mrb[18].mxu1 %vm379_vm1, %v2420_v11  ;;  %3631 = vmatpush3.bf16.msra.mxu0 %v3628_v24 }
 0x7d3   :  { %3623 = vmatpush3.bf16.msra.mxu1 %v3620_v33  ;;  %3472 = vmatprep.mubr.msk.f32.mxu1 %vm379_vm1, %v2429_v21 }
 0x7d6   :  { %3473 = vmatmul.mubr.msk.f32.vlgmr.msra.gmra.mrb[16].mxu1 %vm379_vm1, %v2430_v40 }
 0x7d7   :  { %3475 = vmatprep.mubr.msk.f32.mxu1 %vm379_vm1, %v2431_v58 }
 0x7da   :  { %3476 = vmatmul.mubr.msk.f32.gmra.mrb[18].mxu1 %vm379_vm1, %v2432_v27 }
 0x8a9   :  { %v3474_v57 = vpop.f32.mrb[16].mxu1 }
 0x8aa   :  { %v2729_v59 = vsel %vm379_vm1, %v3474_v57, 0.0  ;;  %v2743_v35 = vmul.f32 %v3474_v57, %v3474_v57  ;;  %v2705_v18 = vpop.f32.mrb[17].mxu1 }
 0x8ab   :  { %v2728_v25 = vsel %vm379_vm1, %v2705_v18, 0.0  ;;  %v2742_v31 = vmul.f32 %v2705_v18, %v2705_v18 }
 0x8ac   :  { %v2747_v10 = vsel %vm379_vm1, %v2743_v35, 0.0  ;;  %v2730_v26 = vadd.f32 %v2729_v59, %v2728_v25 }
 0x8ad   :  { %v2746_v7 = vsel %vm379_vm1, %v2742_v31, 0.0  ;;  %v3477_v20 = vpop.f32.mrb[18].mxu1 }
 0x8ae   :  { %v2748_v17 = vadd.f32 %v2747_v10, %v2746_v7  ;;  %v2715_v38 = vpop.f32.mrb[19].mxu1  ;;  %v2745_v39 = vmul.f32 %v3477_v20, %v3477_v20  ;;  %v2733_v48 = vsel %vm379_vm1, %v3477_v20, 0.0 }
 0x8af   :  { %v2731_v44 = vsel %vm379_vm1, %v2715_v38, 0.0  ;;  %v2744_v45 = vmul.f32 %v2715_v38, %v2715_v38 }
 0x8b0   :  { %v2732_v47 = vadd.f32 %v2731_v44, %v2730_v26  ;;  %v2751_v55 = vsel %vm379_vm1, %v2745_v39, 0.0 }
 0x8b1   :  { %v2749_v36 = vsel %vm379_vm1, %v2744_v45, 0.0 }
 0x8b2   :  { %v2734_v49 = vadd.f32 %v2733_v48, %v2732_v47  ;;  %v2750_v56 = vadd.f32 %v2749_v36, %v2748_v17 }
 0x8b4   :  { %v2735_v54 = vrot.slane %v2734_v49, 4  ;;  %v2752_v52 = vadd.f32 %v2751_v55, %v2750_v56 }
 0x8b6   :  { %v2736_v60 = vadd.f32 %v2735_v54, %v2734_v49  ;;  %v2753_v61 = vrot.slane %v2752_v52, 4 }
 0x8b8   :  { %v2737_v41 = vrot.slane %v2736_v60, 2  ;;  %v2754_v37 = vadd.f32 %v2753_v61, %v2752_v52 }
 0x8ba   :  { %v2738_v53 = vadd.f32 %v2737_v41, %v2736_v60  ;;  %v2755_v51 = vrot.slane %v2754_v37, 2 }
 0x8bc   :  { %v2739_v62 = vrot.slane %v2738_v53, 1  ;;  %v2756_v0 = vadd.f32 %v2755_v51, %v2754_v37  ;;  %v3826_v51 = vmov 0.0  }
 0x8bd   :  { %2932 = vst [vmem:[%s4350_s21 + $0x8] sm:$0xff] %v3826_v51  ;;  %2931 = vst [vmem:[%s4350_s21] sm:$0xff] %v3826_v51 }
 0x8be   :  { %v2740_v2 = vadd.f32 %v2739_v62, %v2738_v53  ;;  %v2757_v63 = vrot.slane %v2756_v0, 1  ;;  %2933 = vst [vmem:[%s4350_s21 + $0x10] sm:$0xff] %v3826_v51  ;;  %2934 = vst [vmem:[%s4350_s21 + $0x18] sm:$0xff] %v3826_v51  ;;  %v3084_v62 = vld [vmem:[%s3003_s25] ss:$0 sm:$0xff] }
 0x8c0   :  { %v2741_v4 = vmul.f32 0.03125, %v2740_v2  ;;  %v2758_v8 = vadd.f32 %v2757_v63, %v2756_v0 }
 0x8c2   :  { %v2759_v12 = vmul.f32 0.03125, %v2758_v8  ;;  %v2760_v13 = vmul.f32 %v2741_v4, %v2741_v4  ;;  %v2946_v8 = vpop.permute.xlu1 %2945 }
 0x8c4   :  { %v2761_v14 = vsub.f32 %v2759_v12, %v2760_v13  ;;  %v3781_v12 = vld [vmem:[%s3844_s13 + $0x8] sm:$0xff] }
 0x8c6   :  { %v2762_v9 = vmax.f32 %v2761_v14, 0.0  ;;  %v2944_v14 = vpop.permute.xlu0 %2943 }
 0x8c8   :  { %v2763_v16 = vadd.f32 1e-05, %v2762_v9  ;;  %v3782_v9 = vld [vmem:[%s3844_s13] sm:$0xff] }
 0x8ca   :  { %3771 = vrsqrt.f32 %v2763_v16 }
 0x8d4   :  { %v3772_v3 = vpop.eup %3771 }
 0x8d5   :  { %v2765_v1 = vmul.f32 %v3772_v3, %v274_v46 }
 0x8d7   :  { %v2766_v5 = vmul.f32 %v2765_v1, %v2741_v4  ;;  %v2772_v22 = vrot.slane %v2765_v1, %v3934_v23 }
 0x8d9   :  { %v2767_v28 = vsub.f32 %v275_v19, %v2766_v5  ;;  %v2774_v30 = vmul.f32 %v2772_v22, %v2705_v18  ;;  %v2775_v32 = vmul.f32 %v3474_v57, %v2772_v22  ;;  %v2776_v6 = vmul.f32 %v2772_v22, %v2715_v38  ;;  %v3783_v5 = vld [vmem:[%s3844_s13 + $0x18] sm:$0xff] }
 0x8da   :  { %v2777_v33 = vmul.f32 %v3477_v20, %v2772_v22 }
 0x8db   :  { %v2782_v34 = vrot.slane %v2767_v28, %v3934_v23  ;;  %v3784_v28 = vld [vmem:[%s3844_s13 + $0x10] sm:$0xff] }
 0x8dd   :  { %v2784_v11 = vadd.f32 %v2782_v34, %v2774_v30  ;;  %v2785_v21 = vadd.f32 %v2782_v34, %v2775_v32  ;;  %v2786_v40 = vadd.f32 %v2782_v34, %v2776_v6  ;;  %v2787_v58 = vadd.f32 %v2782_v34, %v2777_v33  ;;  %v2950_v32 = vpop.permute.xlu1 %2949  ;;  %v2948_v6 = vpop.permute.xlu0 %2947 }
 0x8df   :  { %v2794_v27 = vmul.f32 0.044715, %v2786_v40  ;;  %v2792_v50 = vmul.f32 0.044715, %v2784_v11  ;;  %v2793_v42 = vmul.f32 0.044715, %v2785_v21 }
 0x8e0   :  { %v2795_v15 = vmul.f32 0.044715, %v2787_v58  ;;  %v2788_v45 = vmul.f32 0.5, %v2784_v11  ;;  %v2789_v36 = vmul.f32 0.5, %v2785_v21  ;;  %v2790_v54 = vmul.f32 0.5, %v2786_v40 }
 0x8e1   :  { %v2798_v29 = vmul.f32 %v2794_v27, %v2786_v40  ;;  %v2796_v43 = vmul.f32 %v2792_v50, %v2784_v11  ;;  %v2797_v24 = vmul.f32 %v2793_v42, %v2785_v21  ;;  %v2791_v37 = vmul.f32 0.5, %v2787_v58 }
 0x8e2   :  { %v2799_v59 = vmul.f32 %v2795_v15, %v2787_v58 }
 0x8e3   :  { %v2800_v35 = vmul.f32 %v2796_v43, %v2784_v11  ;;  %v2802_v25 = vmul.f32 %v2798_v29, %v2786_v40  ;;  %v2801_v18 = vmul.f32 %v2797_v24, %v2785_v21 }
 0x8e4   :  { %v2803_v57 = vmul.f32 %v2799_v59, %v2787_v58 }
 0x8e5   :  { %v2804_v31 = vadd.f32 %v2800_v35, %v2784_v11  ;;  %v2806_v10 = vadd.f32 %v2802_v25, %v2786_v40  ;;  %v2805_v26 = vadd.f32 %v2801_v18, %v2785_v21 }
 0x8e6   :  { %v2807_v23 = vadd.f32 %v2803_v57, %v2787_v58 }
 0x8e7   :  { %v2808_v7 = vmul.f32 0.7978846, %v2804_v31  ;;  %v2810_v20 = vmul.f32 0.7978846, %v2806_v10  ;;  %v2809_v17 = vmul.f32 0.7978846, %v2805_v26 }
 0x8e8   :  { %v2811_v38 = vmul.f32 0.7978846, %v2807_v23 }
 0x8e9   :  { %3773 = vtanh.f32 %v2808_v7 }
 0x8ea   :  { %3775 = vtanh.f32 %v2809_v17 }
 0x8eb   :  { %3777 = vtanh.f32 %v2810_v20 }
 0x8ec   :  { %3779 = vtanh.f32 %v2811_v38 }
 0x8f3   :  { %v3774_v39 = vpop.eup %3773 }
 0x8f4   :  { %v3776_v44 = vpop.eup %3775  ;;  %v2816_v47 = vadd.f32 1.0, %v3774_v39 }
 0x8f5   :  { %v3778_v48 = vpop.eup %3777  ;;  %v2817_v49 = vadd.f32 1.0, %v3776_v44 }
 0x8f6   :  { %v3780_v56 = vpop.eup %3779  ;;  %v2820_v55 = vmul.f32 %v2816_v47, %v2788_v45  ;;  %v2818_v52 = vadd.f32 1.0, %v3778_v48 }
 0x8f7   :  { %v2821_v60 = vmul.f32 %v2817_v49, %v2789_v36  ;;  %v2819_v61 = vadd.f32 1.0, %v3780_v56 }
 0x8f8   :  { %3486 = vmatprep.mubr.msk.f32.mxu0 %vm379_vm1, %v2820_v55  ;;  %v2822_v41 = vmul.f32 %v2818_v52, %v2790_v54 }
 0x8f9   :  { %3487 = vmatmul.mubr.msk.f32.vlgmr.msra.gmra.mrb[16].mxu0 %vm379_vm1, %v2821_v60  ;;  %v2823_v53 = vmul.f32 %v2819_v61, %v2791_v37 }
 0x8fa   :  { %3489 = vmatprep.mubr.msk.f32.mxu0 %vm379_vm1, %v2822_v41 }
 0x8fd   :  { %3490 = vmatmul.mubr.msk.f32.gmra.mrb[18].mxu0 %vm379_vm1, %v2823_v53 }
 0x9cc   :  { %v3488_v0 = vpop.f32.mrb[16].mxu0 }
 0x9cd   :  { %v2914_v2 = vadd.f32 %v3488_v0, %v3084_v62  ;;  %v2908_v63 = vpop.f32.mrb[17].mxu0 }
 0x9ce   :  { %v2909_v4 = vadd.f32 %v3084_v62, %v2908_v63 }
 0x9cf   :  { %v2928_v13 = vadd.f32 %v3781_v12, %v2914_v2 }
 0x9d0   :  { %v2927_v16 = vadd.f32 %v3782_v9, %v2909_v4  ;;  %v3491_v46 = vpop.f32.mrb[18].mxu0 }
 0x9d1   :  { %2936 = vst.msk [vmem:[%s4350_s21 + $0x8] sm:$0xff] %vm379_vm1, %v2928_v13  ;;  %v2924_v3 = vadd.f32 %v3491_v46, %v3084_v62  ;;  %v2918_v1 = vpop.f32.mrb[19].mxu0 }
 0x9d2   :  { %2957 = vst.msk [vmem:[%s4350_s21 + $0x8] sm:$0xff] %vm2955_vm5, %v2946_v8  ;;  %v2919_v19 = vadd.f32 %v3084_v62, %v2918_v1 }
 0x9d3   :  { %2935 = vst.msk [vmem:[%s4350_s21] sm:$0xff] %vm379_vm1, %v2927_v16  ;;  %v2930_v22 = vadd.f32 %v3783_v5, %v2924_v3 }
 0x9d4   :  { %2956 = vst.msk [vmem:[%s4350_s21] sm:$0xff] %vm2955_vm5, %v2944_v14  ;;  %v2929_v30 = vadd.f32 %v3784_v28, %v2919_v19 }
 0x9d5   :  { %2938 = vst.msk [vmem:[%s4350_s21 + $0x18] sm:$0xff] %vm379_vm1, %v2930_v22 }
 0x9d6   :  { %2959 = vst.msk [vmem:[%s4350_s21 + $0x18] sm:$0xff] %vm2955_vm5, %v2950_v32 }
 0x9d7   :  { %2937 = vst.msk [vmem:[%s4350_s21 + $0x10] sm:$0xff] %vm379_vm1, %v2929_v30 }
 0x9d8   :  { %2958 = vst.msk [vmem:[%s4350_s21 + $0x10] sm:$0xff] %vm2955_vm5, %v2948_v6 }

</bundles_post_ra>
